<compile_context>
chip_gen: v6e
topology: v6e:2x2x1
jax: 0.10.0
libtpu: 0.0.40
codegen_flags: <defaults>
</compile_context>

<pallas_src>
import functools

import jax
import jax.numpy as jnp
from jax import lax
from jax.experimental import pallas as pl
from jax.experimental.pallas import tpu as pltpu

EPS = 1e-10  # matches `eps` in the PyTorch source


def _pick_tile(dim, cap, align):
    """Largest tile <= cap that is a multiple of `align` and divides `dim`.

    Falls back to the full extent (always legal for a BlockSpec and never
    reads padded garbage into a reduction)."""
    if dim <= cap:
        return dim
    t = (cap // align) * align
    while t >= align:
        if dim % t == 0:
            return t
        t -= align
    return dim


# ---------------------------------------------------------------------------
# Tiled matmul + bias:  out = x @ w + bias   (K-tiled, f32 accumulator)
# ---------------------------------------------------------------------------
def _matmul_bias_kernel(x_ref, w_ref, b_ref, o_ref, acc_ref):
    k = pl.program_id(2)

    @pl.when(k == 0)
    def _():
        acc_ref[...] = jnp.zeros_like(acc_ref)

    acc_ref[...] += jnp.dot(x_ref[...], w_ref[...],
                            preferred_element_type=jnp.float32)

    @pl.when(k == pl.num_programs(2) - 1)
    def _():
        o_ref[...] = (acc_ref[...] + b_ref[...]).astype(o_ref.dtype)


def _matmul_bias(x2d, w2d, bias, *, out_dtype,
                 tm_cap=256, tn_cap=512, tk_cap=512):
    """x2d: (M, K), w2d: (K, Nout), bias: (Nout,) -> (M, Nout)."""
    M, K = x2d.shape
    K2, Nout = w2d.shape
    assert K == K2
    # Tile sizes: multiples of (8, 128) (or full extent). The K tile always
    # divides K exactly so no padded garbage enters the accumulator.
    tm = _pick_tile(M, tm_cap, 8)
    tn = _pick_tile(Nout, tn_cap, 128)
    tk = _pick_tile(K, tk_cap, 128)
    bias2d = bias.reshape(1, Nout).astype(jnp.float32)

    grid = (pl.cdiv(M, tm), pl.cdiv(Nout, tn), pl.cdiv(K, tk))

    # Blocks are bounded (<~ a few MiB double-buffered) independent of E, so
    # no explicit vmem_limit_bytes is needed even on v7x (64 MiB / TC).
    return pl.pallas_call(
        _matmul_bias_kernel,
        out_shape=jax.ShapeDtypeStruct((M, Nout), out_dtype),
        grid_spec=pltpu.PrefetchScalarGridSpec(
            num_scalar_prefetch=0,
            grid=grid,
            in_specs=[
                pl.BlockSpec((tm, tk), lambda i, j, k: (i, k)),   # activations
                pl.BlockSpec((tk, tn), lambda i, j, k: (k, j)),   # weights
                pl.BlockSpec((1, tn), lambda i, j, k: (0, j)),    # bias
            ],
            out_specs=pl.BlockSpec((tm, tn), lambda i, j, k: (i, j)),
            scratch_shapes=[pltpu.VMEM((tm, tn), jnp.float32)],
        ),
        compiler_params=pltpu.CompilerParams(
            dimension_semantics=("parallel", "parallel", "arbitrary"),
        ),
    )(x2d, w2d, bias2d)


# ---------------------------------------------------------------------------
# Attention core: all heads per step, flash-style online softmax over k-tiles
# ---------------------------------------------------------------------------
def _attention_kernel(q_ref, k_ref, v_ref, o_ref, m_ref, l_ref, acc_ref,
                      *, n_heads, d_head, tq, tk, scale):
    # q_ref : (tq,  n_heads*d_head)   rows = this batch's q-tile
    # k_ref : (tk,  n_heads*d_head)   rows = this batch's k-tile
    # v_ref : (tk,  n_heads*d_head)
    # o_ref : (tq,  n_heads*d_head)   lane-dense output block
    # m_ref / l_ref : (n_heads, tq, 1) f32 scratch (online-softmax state)
    # acc_ref       : (n_heads, tq, d_head) f32 scratch
    ki = pl.program_id(2)
    nk = pl.num_programs(2)

    @pl.when(ki == 0)
    def _():
        m_ref[...] = jnp.full_like(m_ref, -jnp.inf)
        l_ref[...] = jnp.zeros_like(l_ref)
        acc_ref[...] = jnp.zeros_like(acc_ref)

    # Per-tile causal mask, shared by all heads. Masked (future) entries are
    # set to EPS (PyTorch quirk) -- they still contribute to the softmax, so
    # every key tile must be visited (no tile skipping).
    q0 = pl.program_id(1) * tq
    k0 = ki * tk
    qpos = q0 + lax.broadcasted_iota(jnp.int32, (tq, tk), 0)
    kpos = k0 + lax.broadcasted_iota(jnp.int32, (tq, tk), 1)
    masked = qpos < kpos

    scale_c = jnp.asarray(scale, dtype=q_ref.dtype)

    # Static loop over heads (n_heads is small); each head is a (tq,H)x(tk,H)
    # score matmul feeding the shared online-softmax state.
    for n in range(n_heads):
        c0 = n * d_head
        q = q_ref[:, pl.ds(c0, d_head)] * scale_c   # fold 1/sqrt(H) into q
        k = k_ref[:, pl.ds(c0, d_head)]
        v = v_ref[:, pl.ds(c0, d_head)]

        s = lax.dot_general(q, k, (((1,), (1,)), ((), ())),
                            preferred_element_type=jnp.float32)   # (tq, tk)
        s = jnp.where(masked, jnp.float32(EPS), s)

        m_prev = m_ref[n]                                          # (tq, 1)
        m_new = jnp.maximum(m_prev, jnp.max(s, axis=-1, keepdims=True))
        alpha = jnp.exp(m_prev - m_new)
        p = jnp.exp(s - m_new)
        l_ref[n] = alpha * l_ref[n] + jnp.sum(p, axis=-1, keepdims=True)
        pv = jnp.dot(p.astype(v.dtype), v, preferred_element_type=jnp.float32)
        acc_ref[n] = alpha * acc_ref[n] + pv
        m_ref[n] = m_new

    @pl.when(ki == nk - 1)
    def _():
        for n in range(n_heads):
            # Exact divide keeps the f32 path within tight tolerance of the
            # XLA reference; pl.reciprocal(l, approx=True) is a drop-in EUP
            # optimization for production.
            o_ref[:, pl.ds(n * d_head, d_head)] = (
                acc_ref[n] / l_ref[n]).astype(o_ref.dtype)


# ---------------------------------------------------------------------------
# Full attention forward
# ---------------------------------------------------------------------------
@functools.partial(jax.jit, static_argnames=("compute_dtype",))
def attention_forward(residual, W_query, W_key, W_values, W_output,
                      Bias_query, Bias_key, Bias_values, Bias_output,
                      *, compute_dtype=jnp.float32):
    """residual: (B, S, E); W_q/k/v: (N, E, H); W_output: (N, H, E)."""
    B, S, E = residual.shape
    N, E2, H = W_query.shape
    assert E == E2
    M = B * S
    NH = N * H
    if B > 1 and S % 8 != 0:
        raise ValueError("seq_len must be a multiple of 8 when batch > 1")

    x2d = residual.reshape(M, E).astype(compute_dtype)

    # Fuse the three projections into one matmul: (M, E) @ (E, 3*N*H).
    def to_mat(w):  # (N, E, H) -> (E, N*H), col index = n*H + h
        return jnp.transpose(w, (1, 0, 2)).reshape(E, NH)

    w_qkv = jnp.concatenate(
        [to_mat(W_query), to_mat(W_key), to_mat(W_values)],
        axis=1).astype(compute_dtype)
    b_qkv = jnp.concatenate(
        [Bias_query.reshape(-1), Bias_key.reshape(-1),
         Bias_values.reshape(-1)]).astype(jnp.float32)

    qkv = _matmul_bias(x2d, w_qkv, b_qkv, out_dtype=compute_dtype)  # (M, 3NH)

    # --- attention core reads Q/K/V directly from the fused qkv buffer -----
    # Column-block index maps select the Q / K / V column ranges, so no split
    # or (B,S,N,H) transpose materializes in HBM. Falls back to a split when
    # NH is not lane-aligned.
    if NH % 128 == 0:
        q_in, k_in, v_in = qkv, qkv, qkv
        q_col, k_col, v_col = 0, 1, 2
    else:
        q_in, k_in, v_in = jnp.split(qkv, 3, axis=1)
        q_col = k_col = v_col = 0

    tq = _pick_tile(S, 256, 8)     # coarse q-tiles keep the MXU M-dim full
    tkk = _pick_tile(S, 256, 8)    # flash-style key tiling bounds VMEM in S
    rq, rk = S // tq, S // tkk

    q_spec = pl.BlockSpec((tq, NH), lambda b, qi, ki: (b * rq + qi, q_col))
    k_spec = pl.BlockSpec((tkk, NH), lambda b, qi, ki: (b * rk + ki, k_col))
    v_spec = pl.BlockSpec((tkk, NH), lambda b, qi, ki: (b * rk + ki, v_col))
    o_spec = pl.BlockSpec((tq, NH), lambda b, qi, ki: (b * rq + qi, 0))

    scale = 1.0 / (float(H) ** 0.5)
    kern = functools.partial(_attention_kernel, n_heads=N, d_head=H,
                             tq=tq, tk=tkk, scale=scale)

    wv2d = pl.pallas_call(
        kern,
        out_shape=jax.ShapeDtypeStruct((M, NH), compute_dtype),
        grid_spec=pltpu.PrefetchScalarGridSpec(
            num_scalar_prefetch=0,
            grid=(B, rq, rk),
            in_specs=[q_spec, k_spec, v_spec],
            out_specs=o_spec,
            scratch_shapes=[
                pltpu.VMEM((N, tq, 1), jnp.float32),   # m (online-softmax max)
                pltpu.VMEM((N, tq, 1), jnp.float32),   # l (online-softmax sum)
                pltpu.VMEM((N, tq, H), jnp.float32),   # acc
            ],
        ),
        compiler_params=pltpu.CompilerParams(
            dimension_semantics=("parallel", "parallel", "arbitrary"),
        ),
    )(q_in, k_in, v_in)

    # Output projection: summing over heads is folded into (M, N*H) @ (N*H, E).
    w_out = W_output.reshape(NH, E).astype(compute_dtype)
    out2d = _matmul_bias(wv2d, w_out, Bias_output.astype(jnp.float32),
                         out_dtype=jnp.float32)
    return out2d.reshape(B, S, E)


# ---------------------------------------------------------------------------
# Plain-JAX reference mirroring the PyTorch forward (for verification)
# ---------------------------------------------------------------------------
def _reference(residual, W_query, W_key, W_values, W_output,
               Bias_query, Bias_key, Bias_values, Bias_output):
    keys = jnp.einsum("bse,neh->bsnh", residual, W_key) + Bias_key
    queries = jnp.einsum("bse,neh->bsnh", residual, W_query) + Bias_query
    values = jnp.einsum("bse,neh->bsnh", residual, W_values) + Bias_values
    H = W_key.shape[-1]
    S = residual.shape[1]
    scores = jnp.einsum("bknh,bqnh->bnqk", keys, queries) / (H ** 0.5)
    qi = jnp.arange(S)[:, None]
    ki = jnp.arange(S)[None, :]
    scores = jnp.where((qi < ki)[None, None], EPS, scores)
    probs = jax.nn.softmax(scores, axis=3)
    wv = jnp.einsum("bnqk,bknh->bqnh", probs, values)
    head_out = jnp.einsum("bqnh,nhe->bqne", wv, W_output)
    return jnp.sum(head_out, axis=2) + Bias_output


if __name__ == "__main__":
    # Small config consistent with the module's forward.
    batch, seq, n_heads, d_model, d_head = 2, 8, 4, 128, 32
    init_range = 0.02

    key = jax.random.PRNGKey(0)
    ks = jax.random.split(key, 9)

    residual = jax.random.normal(ks[0], (batch, seq, d_model), dtype=jnp.float32)
    W_query = init_range * jax.random.normal(ks[1], (n_heads, d_model, d_head), dtype=jnp.float32)
    W_key = init_range * jax.random.normal(ks[2], (n_heads, d_model, d_head), dtype=jnp.float32)
    W_values = init_range * jax.random.normal(ks[3], (n_heads, d_model, d_head), dtype=jnp.float32)
    W_output = init_range * jax.random.normal(ks[4], (n_heads, d_head, d_model), dtype=jnp.float32)
    # Module initializes biases to zero; use small nonzero values so the
    # bias-add path is exercised (semantics unchanged).
    Bias_query = init_range * jax.random.normal(ks[5], (n_heads, d_head), dtype=jnp.float32)
    Bias_key = init_range * jax.random.normal(ks[6], (n_heads, d_head), dtype=jnp.float32)
    Bias_values = init_range * jax.random.normal(ks[7], (n_heads, d_head), dtype=jnp.float32)
    Bias_output = init_range * jax.random.normal(ks[8], (d_model,), dtype=jnp.float32)

    args = (residual, W_query, W_key, W_values, W_output,
            Bias_query, Bias_key, Bias_values, Bias_output)

    ref = _reference(*args)

    # f32 path: tight parity with the PyTorch/XLA reference.
    out = attention_forward(*args, compute_dtype=jnp.float32)
    jax.block_until_ready(out)
    assert out.shape == (batch, seq, d_model)
    assert jnp.allclose(out, ref, atol=2e-4, rtol=2e-4), (
        float(jnp.max(jnp.abs(out - ref))))

    # bf16 operands / f32 accumulation path (recommended production setting):
    # same structure, halved HBM traffic + bf16 MXU rate.
    out_bf16 = attention_forward(*args, compute_dtype=jnp.bfloat16)
    jax.block_until_ready(out_bf16)
    assert jnp.allclose(out_bf16, ref, atol=5e-2, rtol=5e-2), (
        float(jnp.max(jnp.abs(out_bf16 - ref))))

    print("KERNEL_OK")
</pallas_src>

<mosaic_0001>
module attributes {stable_mosaic.version = 11 : i64} {
  func.func @_matmul_bias_kernel(%arg0: i32, %arg1: i32, %arg2: i32, %arg3: memref<16x128xf32, #tpu.memory_space<vmem>>, %arg4: memref<128x384xf32, #tpu.memory_space<vmem>>, %arg5: memref<1x384xf32, #tpu.memory_space<vmem>>, %arg6: memref<16x384xf32, #tpu.memory_space<vmem>>, %arg7: memref<16x384xf32, #tpu.memory_space<vmem>>) attributes {dimension_semantics = [#tpu.dimension_semantics<parallel>, #tpu.dimension_semantics<parallel>, #tpu.dimension_semantics<arbitrary>], iteration_bounds = array<i64: 1, 1, 1>, scalar_prefetch = 0 : i64, scratch_operands = 1 : i64, tpu.core_type = #tpu.core_type<tc>, window_params = [{transform_indices = @transform_0, window_bounds = array<i64: 16, 128>}, {transform_indices = @transform_1, window_bounds = array<i64: 128, 384>}, {transform_indices = @transform_2, window_bounds = array<i64: 1, 384>}, {transform_indices = @transform_3, window_bounds = array<i64: 16, 384>}]} {
    %c0_i32 = arith.constant 0 : i32
    %0 = arith.cmpi eq, %arg2, %c0_i32 : i32
    %1 = arith.extui %0 : i1 to i32
    %c0_i32_0 = arith.constant 0 : i32
    %2 = arith.cmpi ne, %1, %c0_i32_0 : i32
    scf.if %2 {
      %cst_10 = arith.constant 0.000000e+00 : f32
      %12 = vector.broadcast %cst_10 : f32 to vector<16x384xf32>
      %c0_11 = arith.constant 0 : index
      %c0_12 = arith.constant 0 : index
      %13 = vector.load %arg7[%c0_11, %c0_12] : memref<16x384xf32, #tpu.memory_space<vmem>>, vector<16x384xf32>
      tpu.vector_store %arg7[%c0_11, %c0_12], %12 {strides = array<i32>} : memref<16x384xf32, #tpu.memory_space<vmem>>, vector<16x384xf32>,
    } else {
    }
    %c0 = arith.constant 0 : index
    %c0_1 = arith.constant 0 : index
    %3 = vector.load %arg7[%c0, %c0_1] : memref<16x384xf32, #tpu.memory_space<vmem>>, vector<16x384xf32>
    %c0_2 = arith.constant 0 : index
    %c0_3 = arith.constant 0 : index
    %4 = vector.load %arg3[%c0_2, %c0_3] : memref<16x128xf32, #tpu.memory_space<vmem>>, vector<16x128xf32>
    %c0_4 = arith.constant 0 : index
    %c0_5 = arith.constant 0 : index
    %5 = vector.load %arg4[%c0_4, %c0_5] : memref<128x384xf32, #tpu.memory_space<vmem>>, vector<128x384xf32>
    %cst = arith.constant dense<0.000000e+00> : vector<16x384xf32>
    %6 = tpu.matmul %4, %5, %cst {dimension_numbers = #tpu.dot_dimension_numbers<[1], [0], [0], [1], [0, 0, 1, 1], [], []>} : vector<16x128xf32>, vector<128x384xf32>, vector<16x384xf32> -> vector<16x384xf32>
    %7 = arith.addf %3, %6 : vector<16x384xf32>
    %c0_6 = arith.constant 0 : index
    %c0_7 = arith.constant 0 : index
    %8 = vector.load %arg7[%c0_6, %c0_7] : memref<16x384xf32, #tpu.memory_space<vmem>>, vector<16x384xf32>
    tpu.vector_store %arg7[%c0_6, %c0_7], %7 {strides = array<i32>} : memref<16x384xf32, #tpu.memory_space<vmem>>, vector<16x384xf32>,
    %c0_i32_8 = arith.constant 0 : i32
    %9 = arith.cmpi eq, %arg2, %c0_i32_8 : i32
    %10 = arith.extui %9 : i1 to i32
    %c0_i32_9 = arith.constant 0 : i32
    %11 = arith.cmpi ne, %10, %c0_i32_9 : i32
    scf.if %11 {
      %c0_10 = arith.constant 0 : index
      %c0_11 = arith.constant 0 : index
      %12 = vector.load %arg7[%c0_10, %c0_11] : memref<16x384xf32, #tpu.memory_space<vmem>>, vector<16x384xf32>
      %c0_12 = arith.constant 0 : index
      %c0_13 = arith.constant 0 : index
      %13 = vector.load %arg5[%c0_12, %c0_13] : memref<1x384xf32, #tpu.memory_space<vmem>>, vector<1x384xf32>
      %14 = vector.broadcast %13 : vector<1x384xf32> to vector<16x384xf32>
      %15 = arith.addf %12, %14 : vector<16x384xf32>
      %c0_14 = arith.constant 0 : index
      %c0_15 = arith.constant 0 : index
      %16 = vector.load %arg6[%c0_14, %c0_15] : memref<16x384xf32, #tpu.memory_space<vmem>>, vector<16x384xf32>
      tpu.vector_store %arg6[%c0_14, %c0_15], %15 {strides = array<i32>} : memref<16x384xf32, #tpu.memory_space<vmem>>, vector<16x384xf32>,
    } else {
    }
    return
  }
  func.func @transform_0(%arg0: i32, %arg1: i32, %arg2: i32) -> (i32, i32) {
    %c0_i32 = arith.constant 0 : i32
    return %arg0, %arg2 : i32, i32
  }
  func.func @transform_1(%arg0: i32, %arg1: i32, %arg2: i32) -> (i32, i32) {
    %c0_i32 = arith.constant 0 : i32
    return %arg2, %arg1 : i32, i32
  }
  func.func @transform_2(%arg0: i32, %arg1: i32, %arg2: i32) -> (i32, i32) {
    %c0_i32 = arith.constant 0 : i32
    %c0_i32_0 = arith.constant 0 : i32
    return %c0_i32, %arg1 : i32, i32
  }
  func.func @transform_3(%arg0: i32, %arg1: i32, %arg2: i32) -> (i32, i32) {
    %c0_i32 = arith.constant 0 : i32
    return %arg0, %arg1 : i32, i32
  }
}

module attributes {stable_mosaic.version = 11 : i64} {
  func.func @_matmul_bias_kernel(%arg0: i32, %arg1: i32, %arg2: i32, %arg3: memref<16x128xf32, #tpu.memory_space<vmem>>, %arg4: memref<128x128xf32, #tpu.memory_space<vmem>>, %arg5: memref<1x128xf32, #tpu.memory_space<vmem>>, %arg6: memref<16x128xf32, #tpu.memory_space<vmem>>, %arg7: memref<16x128xf32, #tpu.memory_space<vmem>>) attributes {dimension_semantics = [#tpu.dimension_semantics<parallel>, #tpu.dimension_semantics<parallel>, #tpu.dimension_semantics<arbitrary>], iteration_bounds = array<i64: 1, 1, 1>, scalar_prefetch = 0 : i64, scratch_operands = 1 : i64, tpu.core_type = #tpu.core_type<tc>, window_params = [{transform_indices = @transform_0, window_bounds = array<i64: 16, 128>}, {transform_indices = @transform_1, window_bounds = array<i64: 128, 128>}, {transform_indices = @transform_2, window_bounds = array<i64: 1, 128>}, {transform_indices = @transform_3, window_bounds = array<i64: 16, 128>}]} {
    %c0_i32 = arith.constant 0 : i32
    %0 = arith.cmpi eq, %arg2, %c0_i32 : i32
    %1 = arith.extui %0 : i1 to i32
    %c0_i32_0 = arith.constant 0 : i32
    %2 = arith.cmpi ne, %1, %c0_i32_0 : i32
    scf.if %2 {
      %cst_10 = arith.constant 0.000000e+00 : f32
      %12 = vector.broadcast %cst_10 : f32 to vector<16x128xf32>
      %c0_11 = arith.constant 0 : index
      %c0_12 = arith.constant 0 : index
      %13 = vector.load %arg7[%c0_11, %c0_12] : memref<16x128xf32, #tpu.memory_space<vmem>>, vector<16x128xf32>
      tpu.vector_store %arg7[%c0_11, %c0_12], %12 {strides = array<i32>} : memref<16x128xf32, #tpu.memory_space<vmem>>, vector<16x128xf32>,
    } else {
    }
    %c0 = arith.constant 0 : index
    %c0_1 = arith.constant 0 : index
    %3 = vector.load %arg7[%c0, %c0_1] : memref<16x128xf32, #tpu.memory_space<vmem>>, vector<16x128xf32>
    %c0_2 = arith.constant 0 : index
    %c0_3 = arith.constant 0 : index
    %4 = vector.load %arg3[%c0_2, %c0_3] : memref<16x128xf32, #tpu.memory_space<vmem>>, vector<16x128xf32>
    %c0_4 = arith.constant 0 : index
    %c0_5 = arith.constant 0 : index
    %5 = vector.load %arg4[%c0_4, %c0_5] : memref<128x128xf32, #tpu.memory_space<vmem>>, vector<128x128xf32>
    %cst = arith.constant dense<0.000000e+00> : vector<16x128xf32>
    %6 = tpu.matmul %4, %5, %cst {dimension_numbers = #tpu.dot_dimension_numbers<[1], [0], [0], [1], [0, 0, 1, 1], [], []>} : vector<16x128xf32>, vector<128x128xf32>, vector<16x128xf32> -> vector<16x128xf32>
    %7 = arith.addf %3, %6 : vector<16x128xf32>
    %c0_6 = arith.constant 0 : index
    %c0_7 = arith.constant 0 : index
    %8 = vector.load %arg7[%c0_6, %c0_7] : memref<16x128xf32, #tpu.memory_space<vmem>>, vector<16x128xf32>
    tpu.vector_store %arg7[%c0_6, %c0_7], %7 {strides = array<i32>} : memref<16x128xf32, #tpu.memory_space<vmem>>, vector<16x128xf32>,
    %c0_i32_8 = arith.constant 0 : i32
    %9 = arith.cmpi eq, %arg2, %c0_i32_8 : i32
    %10 = arith.extui %9 : i1 to i32
    %c0_i32_9 = arith.constant 0 : i32
    %11 = arith.cmpi ne, %10, %c0_i32_9 : i32
    scf.if %11 {
      %c0_10 = arith.constant 0 : index
      %c0_11 = arith.constant 0 : index
      %12 = vector.load %arg7[%c0_10, %c0_11] : memref<16x128xf32, #tpu.memory_space<vmem>>, vector<16x128xf32>
      %c0_12 = arith.constant 0 : index
      %c0_13 = arith.constant 0 : index
      %13 = vector.load %arg5[%c0_12, %c0_13] : memref<1x128xf32, #tpu.memory_space<vmem>>, vector<1x128xf32>
      %14 = vector.broadcast %13 : vector<1x128xf32> to vector<16x128xf32>
      %15 = arith.addf %12, %14 : vector<16x128xf32>
      %c0_14 = arith.constant 0 : index
      %c0_15 = arith.constant 0 : index
      %16 = vector.load %arg6[%c0_14, %c0_15] : memref<16x128xf32, #tpu.memory_space<vmem>>, vector<16x128xf32>
      tpu.vector_store %arg6[%c0_14, %c0_15], %15 {strides = array<i32>} : memref<16x128xf32, #tpu.memory_space<vmem>>, vector<16x128xf32>,
    } else {
    }
    return
  }
  func.func @transform_0(%arg0: i32, %arg1: i32, %arg2: i32) -> (i32, i32) {
    %c0_i32 = arith.constant 0 : i32
    return %arg0, %arg2 : i32, i32
  }
  func.func @transform_1(%arg0: i32, %arg1: i32, %arg2: i32) -> (i32, i32) {
    %c0_i32 = arith.constant 0 : i32
    return %arg2, %arg1 : i32, i32
  }
  func.func @transform_2(%arg0: i32, %arg1: i32, %arg2: i32) -> (i32, i32) {
    %c0_i32 = arith.constant 0 : i32
    %c0_i32_0 = arith.constant 0 : i32
    return %c0_i32, %arg1 : i32, i32
  }
  func.func @transform_3(%arg0: i32, %arg1: i32, %arg2: i32) -> (i32, i32) {
    %c0_i32 = arith.constant 0 : i32
    return %arg0, %arg1 : i32, i32
  }
}

module attributes {stable_mosaic.version = 11 : i64} {
  func.func @_attention_kernel(%arg0: i32, %arg1: i32, %arg2: i32, %arg3: memref<8x128xf32, #tpu.memory_space<vmem>>, %arg4: memref<8x128xf32, #tpu.memory_space<vmem>>, %arg5: memref<8x128xf32, #tpu.memory_space<vmem>>, %arg6: memref<8x128xf32, #tpu.memory_space<vmem>>, %arg7: memref<4x8x1xf32, #tpu.memory_space<vmem>>, %arg8: memref<4x8x1xf32, #tpu.memory_space<vmem>>, %arg9: memref<4x8x32xf32, #tpu.memory_space<vmem>>) attributes {dimension_semantics = [#tpu.dimension_semantics<parallel>, #tpu.dimension_semantics<parallel>, #tpu.dimension_semantics<arbitrary>], iteration_bounds = array<i64: 2, 1, 1>, scalar_prefetch = 0 : i64, scratch_operands = 3 : i64, tpu.core_type = #tpu.core_type<tc>, window_params = [{transform_indices = @transform_0, window_bounds = array<i64: 8, 128>}, {transform_indices = @transform_1, window_bounds = array<i64: 8, 128>}, {transform_indices = @transform_2, window_bounds = array<i64: 8, 128>}, {transform_indices = @transform_3, window_bounds = array<i64: 8, 128>}]} {
    %c0_i32 = arith.constant 0 : i32
    %0 = arith.cmpi eq, %arg2, %c0_i32 : i32
    %1 = arith.extui %0 : i1 to i32
    %c0_i32_0 = arith.constant 0 : i32
    %2 = arith.cmpi ne, %1, %c0_i32_0 : i32
    scf.if %2 {
      %cst_116 = arith.constant 0xFF800000 : f32
      %171 = vector.broadcast %cst_116 : f32 to vector<4x8x1xf32>
      %c0_117 = arith.constant 0 : index
      %c0_118 = arith.constant 0 : index
      %c0_119 = arith.constant 0 : index
      %172 = vector.load %arg7[%c0_117, %c0_118, %c0_119] : memref<4x8x1xf32, #tpu.memory_space<vmem>>, vector<4x8x1xf32>
      tpu.vector_store %arg7[%c0_117, %c0_118, %c0_119], %171 {strides = array<i32>} : memref<4x8x1xf32, #tpu.memory_space<vmem>>, vector<4x8x1xf32>,
      %cst_120 = arith.constant 0.000000e+00 : f32
      %173 = vector.broadcast %cst_120 : f32 to vector<4x8x1xf32>
      %c0_121 = arith.constant 0 : index
      %c0_122 = arith.constant 0 : index
      %c0_123 = arith.constant 0 : index
      %174 = vector.load %arg8[%c0_121, %c0_122, %c0_123] : memref<4x8x1xf32, #tpu.memory_space<vmem>>, vector<4x8x1xf32>
      tpu.vector_store %arg8[%c0_121, %c0_122, %c0_123], %173 {strides = array<i32>} : memref<4x8x1xf32, #tpu.memory_space<vmem>>, vector<4x8x1xf32>,
      %cst_124 = arith.constant 0.000000e+00 : f32
      %175 = vector.broadcast %cst_124 : f32 to vector<4x8x32xf32>
      %c0_125 = arith.constant 0 : index
      %c0_126 = arith.constant 0 : index
      %c0_127 = arith.constant 0 : index
      %176 = vector.load %arg9[%c0_125, %c0_126, %c0_127] : memref<4x8x32xf32, #tpu.memory_space<vmem>>, vector<4x8x32xf32>
      tpu.vector_store %arg9[%c0_125, %c0_126, %c0_127], %175 {strides = array<i32>} : memref<4x8x32xf32, #tpu.memory_space<vmem>>, vector<4x8x32xf32>,
    } else {
    }
    %c8_i32 = arith.constant 8 : i32
    %3 = arith.muli %arg1, %c8_i32 : i32
    %c8_i32_1 = arith.constant 8 : i32
    %4 = arith.muli %arg2, %c8_i32_1 : i32
    %5 = tpu.iota {dimensions = array<i32: 0>} : vector<8x8xi32>
    %6 = vector.broadcast %3 : i32 to vector<8x8xi32>
    %7 = arith.addi %6, %5 : vector<8x8xi32>
    %8 = tpu.iota {dimensions = array<i32: 1>} : vector<8x8xi32>
    %9 = vector.broadcast %4 : i32 to vector<8x8xi32>
    %10 = arith.addi %9, %8 : vector<8x8xi32>
    %11 = arith.cmpi slt, %7, %10 : vector<8x8xi32>
    %c0 = arith.constant 0 : index
    %c0_2 = arith.constant 0 : index
    %12 = vector.load %arg3[%c0, %c0_2] : memref<8x128xf32, #tpu.memory_space<vmem>>, vector<8x32xf32>
    %cst = arith.constant 0.176776692 : f32
    %13 = vector.broadcast %cst : f32 to vector<8x32xf32>
    %14 = arith.mulf %12, %13 : vector<8x32xf32>
    %c0_3 = arith.constant 0 : index
    %c0_4 = arith.constant 0 : index
    %15 = vector.load %arg4[%c0_3, %c0_4] : memref<8x128xf32, #tpu.memory_space<vmem>>, vector<8x32xf32>
    %c0_5 = arith.constant 0 : index
    %c0_6 = arith.constant 0 : index
    %16 = vector.load %arg5[%c0_5, %c0_6] : memref<8x128xf32, #tpu.memory_space<vmem>>, vector<8x32xf32>
    %cst_7 = arith.constant dense<0.000000e+00> : vector<8x8xf32>
    %17 = tpu.matmul %14, %15, %cst_7 {dimension_numbers = #tpu.dot_dimension_numbers<[1], [1], [0], [0], [0, 0, 1, 0], [], []>} : vector<8x32xf32>, vector<8x32xf32>, vector<8x8xf32> -> vector<8x8xf32>
    %cst_8 = arith.constant 1.000000e-10 : f32
    %18 = vector.broadcast %cst_8 : f32 to vector<8x8xf32>
    %19 = arith.select %11, %18, %17 : vector<8x8xi1>, vector<8x8xf32>
    %c0_9 = arith.constant 0 : index
    %c0_10 = arith.constant 0 : index
    %c0_11 = arith.constant 0 : index
    %20 = vector.load %arg7[%c0_9, %c0_10, %c0_11] : memref<4x8x1xf32, #tpu.memory_space<vmem>>, vector<1x8x1xf32>
    %21 = vector.shape_cast %20 : vector<1x8x1xf32> to vector<8x1xf32>
    %cst_12 = arith.constant dense<0xFF800000> : vector<8xf32>
    %22 = vector.multi_reduction <maximumf>, %19, %cst_12 [1] : vector<8x8xf32> to vector<8xf32>
    %23 = vector.shape_cast %22 : vector<8xf32> to vector<8x1xf32>
    %24 = arith.maximumf %21, %23 : vector<8x1xf32>
    %25 = arith.subf %21, %24 : vector<8x1xf32>
    %26 = math.exp %25 : vector<8x1xf32>
    %27 = vector.broadcast %24 : vector<8x1xf32> to vector<8x8xf32>
    %28 = arith.subf %19, %27 : vector<8x8xf32>
    %29 = math.exp %28 : vector<8x8xf32>
    %c0_13 = arith.constant 0 : index
    %c0_14 = arith.constant 0 : index
    %c0_15 = arith.constant 0 : index
    %30 = vector.load %arg8[%c0_13, %c0_14, %c0_15] : memref<4x8x1xf32, #tpu.memory_space<vmem>>, vector<1x8x1xf32>
    %31 = vector.shape_cast %30 : vector<1x8x1xf32> to vector<8x1xf32>
    %32 = arith.mulf %26, %31 : vector<8x1xf32>
    %cst_16 = arith.constant dense<0.000000e+00> : vector<8xf32>
    %33 = vector.multi_reduction <add>, %29, %cst_16 [1] : vector<8x8xf32> to vector<8xf32>
    %34 = vector.shape_cast %33 : vector<8xf32> to vector<8x1xf32>
    %35 = arith.addf %32, %34 : vector<8x1xf32>
    %c0_17 = arith.constant 0 : index
    %c0_18 = arith.constant 0 : index
    %c0_19 = arith.constant 0 : index
    %36 = vector.load %arg8[%c0_17, %c0_18, %c0_19] : memref<4x8x1xf32, #tpu.memory_space<vmem>>, vector<1x8x1xf32>
    %37 = vector.shape_cast %36 : vector<1x8x1xf32> to vector<8x1xf32>
    %38 = vector.shape_cast %35 : vector<8x1xf32> to vector<1x8x1xf32>
    tpu.vector_store %arg8[%c0_17, %c0_18, %c0_19], %38 {strides = array<i32>} : memref<4x8x1xf32, #tpu.memory_space<vmem>>, vector<1x8x1xf32>,
    %cst_20 = arith.constant dense<0.000000e+00> : vector<8x32xf32>
    %39 = tpu.matmul %29, %16, %cst_20 {dimension_numbers = #tpu.dot_dimension_numbers<[1], [0], [0], [1], [0, 0, 1, 1], [], []>} : vector<8x8xf32>, vector<8x32xf32>, vector<8x32xf32> -> vector<8x32xf32>
    %c0_21 = arith.constant 0 : index
    %c0_22 = arith.constant 0 : index
    %c0_23 = arith.constant 0 : index
    %40 = vector.load %arg9[%c0_21, %c0_22, %c0_23] : memref<4x8x32xf32, #tpu.memory_space<vmem>>, vector<1x8x32xf32>
    %41 = vector.shape_cast %40 : vector<1x8x32xf32> to vector<8x32xf32>
    %42 = vector.broadcast %26 : vector<8x1xf32> to vector<8x32xf32>
    %43 = arith.mulf %42, %41 : vector<8x32xf32>
    %44 = arith.addf %43, %39 : vector<8x32xf32>
    %c0_24 = arith.constant 0 : index
    %c0_25 = arith.constant 0 : index
    %c0_26 = arith.constant 0 : index
    %45 = vector.load %arg9[%c0_24, %c0_25, %c0_26] : memref<4x8x32xf32, #tpu.memory_space<vmem>>, vector<1x8x32xf32>
    %46 = vector.shape_cast %45 : vector<1x8x32xf32> to vector<8x32xf32>
    %47 = vector.shape_cast %44 : vector<8x32xf32> to vector<1x8x32xf32>
    tpu.vector_store %arg9[%c0_24, %c0_25, %c0_26], %47 {strides = array<i32>} : memref<4x8x32xf32, #tpu.memory_space<vmem>>, vector<1x8x32xf32>,
    %c0_27 = arith.constant 0 : index
    %c0_28 = arith.constant 0 : index
    %c0_29 = arith.constant 0 : index
    %48 = vector.load %arg7[%c0_27, %c0_28, %c0_29] : memref<4x8x1xf32, #tpu.memory_space<vmem>>, vector<1x8x1xf32>
    %49 = vector.shape_cast %48 : vector<1x8x1xf32> to vector<8x1xf32>
    %50 = vector.shape_cast %24 : vector<8x1xf32> to vector<1x8x1xf32>
    tpu.vector_store %arg7[%c0_27, %c0_28, %c0_29], %50 {strides = array<i32>} : memref<4x8x1xf32, #tpu.memory_space<vmem>>, vector<1x8x1xf32>,
    %c0_30 = arith.constant 0 : index
    %c32 = arith.constant 32 : index
    %51 = vector.load %arg3[%c0_30, %c32] : memref<8x128xf32, #tpu.memory_space<vmem>>, vector<8x32xf32>
    %cst_31 = arith.constant 0.176776692 : f32
    %52 = vector.broadcast %cst_31 : f32 to vector<8x32xf32>
    %53 = arith.mulf %51, %52 : vector<8x32xf32>
    %c0_32 = arith.constant 0 : index
    %c32_33 = arith.constant 32 : index
    %54 = vector.load %arg4[%c0_32, %c32_33] : memref<8x128xf32, #tpu.memory_space<vmem>>, vector<8x32xf32>
    %c0_34 = arith.constant 0 : index
    %c32_35 = arith.constant 32 : index
    %55 = vector.load %arg5[%c0_34, %c32_35] : memref<8x128xf32, #tpu.memory_space<vmem>>, vector<8x32xf32>
    %cst_36 = arith.constant dense<0.000000e+00> : vector<8x8xf32>
    %56 = tpu.matmul %53, %54, %cst_36 {dimension_numbers = #tpu.dot_dimension_numbers<[1], [1], [0], [0], [0, 0, 1, 0], [], []>} : vector<8x32xf32>, vector<8x32xf32>, vector<8x8xf32> -> vector<8x8xf32>
    %cst_37 = arith.constant 1.000000e-10 : f32
    %57 = vector.broadcast %cst_37 : f32 to vector<8x8xf32>
    %58 = arith.select %11, %57, %56 : vector<8x8xi1>, vector<8x8xf32>
    %c1 = arith.constant 1 : index
    %c0_38 = arith.constant 0 : index
    %c0_39 = arith.constant 0 : index
    %59 = vector.load %arg7[%c1, %c0_38, %c0_39] : memref<4x8x1xf32, #tpu.memory_space<vmem>>, vector<1x8x1xf32>
    %60 = vector.shape_cast %59 : vector<1x8x1xf32> to vector<8x1xf32>
    %cst_40 = arith.constant dense<0xFF800000> : vector<8xf32>
    %61 = vector.multi_reduction <maximumf>, %58, %cst_40 [1] : vector<8x8xf32> to vector<8xf32>
    %62 = vector.shape_cast %61 : vector<8xf32> to vector<8x1xf32>
    %63 = arith.maximumf %60, %62 : vector<8x1xf32>
    %64 = arith.subf %60, %63 : vector<8x1xf32>
    %65 = math.exp %64 : vector<8x1xf32>
    %66 = vector.broadcast %63 : vector<8x1xf32> to vector<8x8xf32>
    %67 = arith.subf %58, %66 : vector<8x8xf32>
    %68 = math.exp %67 : vector<8x8xf32>
    %c1_41 = arith.constant 1 : index
    %c0_42 = arith.constant 0 : index
    %c0_43 = arith.constant 0 : index
    %69 = vector.load %arg8[%c1_41, %c0_42, %c0_43] : memref<4x8x1xf32, #tpu.memory_space<vmem>>, vector<1x8x1xf32>
    %70 = vector.shape_cast %69 : vector<1x8x1xf32> to vector<8x1xf32>
    %71 = arith.mulf %65, %70 : vector<8x1xf32>
    %cst_44 = arith.constant dense<0.000000e+00> : vector<8xf32>
    %72 = vector.multi_reduction <add>, %68, %cst_44 [1] : vector<8x8xf32> to vector<8xf32>
    %73 = vector.shape_cast %72 : vector<8xf32> to vector<8x1xf32>
    %74 = arith.addf %71, %73 : vector<8x1xf32>
    %c1_45 = arith.constant 1 : index
    %c0_46 = arith.constant 0 : index
    %c0_47 = arith.constant 0 : index
    %75 = vector.load %arg8[%c1_45, %c0_46, %c0_47] : memref<4x8x1xf32, #tpu.memory_space<vmem>>, vector<1x8x1xf32>
    %76 = vector.shape_cast %75 : vector<1x8x1xf32> to vector<8x1xf32>
    %77 = vector.shape_cast %74 : vector<8x1xf32> to vector<1x8x1xf32>
    tpu.vector_store %arg8[%c1_45, %c0_46, %c0_47], %77 {strides = array<i32>} : memref<4x8x1xf32, #tpu.memory_space<vmem>>, vector<1x8x1xf32>,
    %cst_48 = arith.constant dense<0.000000e+00> : vector<8x32xf32>
    %78 = tpu.matmul %68, %55, %cst_48 {dimension_numbers = #tpu.dot_dimension_numbers<[1], [0], [0], [1], [0, 0, 1, 1], [], []>} : vector<8x8xf32>, vector<8x32xf32>, vector<8x32xf32> -> vector<8x32xf32>
    %c1_49 = arith.constant 1 : index
    %c0_50 = arith.constant 0 : index
    %c0_51 = arith.constant 0 : index
    %79 = vector.load %arg9[%c1_49, %c0_50, %c0_51] : memref<4x8x32xf32, #tpu.memory_space<vmem>>, vector<1x8x32xf32>
    %80 = vector.shape_cast %79 : vector<1x8x32xf32> to vector<8x32xf32>
    %81 = vector.broadcast %65 : vector<8x1xf32> to vector<8x32xf32>
    %82 = arith.mulf %81, %80 : vector<8x32xf32>
    %83 = arith.addf %82, %78 : vector<8x32xf32>
    %c1_52 = arith.constant 1 : index
    %c0_53 = arith.constant 0 : index
    %c0_54 = arith.constant 0 : index
    %84 = vector.load %arg9[%c1_52, %c0_53, %c0_54] : memref<4x8x32xf32, #tpu.memory_space<vmem>>, vector<1x8x32xf32>
    %85 = vector.shape_cast %84 : vector<1x8x32xf32> to vector<8x32xf32>
    %86 = vector.shape_cast %83 : vector<8x32xf32> to vector<1x8x32xf32>
    tpu.vector_store %arg9[%c1_52, %c0_53, %c0_54], %86 {strides = array<i32>} : memref<4x8x32xf32, #tpu.memory_space<vmem>>, vector<1x8x32xf32>,
    %c1_55 = arith.constant 1 : index
    %c0_56 = arith.constant 0 : index
    %c0_57 = arith.constant 0 : index
    %87 = vector.load %arg7[%c1_55, %c0_56, %c0_57] : memref<4x8x1xf32, #tpu.memory_space<vmem>>, vector<1x8x1xf32>
    %88 = vector.shape_cast %87 : vector<1x8x1xf32> to vector<8x1xf32>
    %89 = vector.shape_cast %63 : vector<8x1xf32> to vector<1x8x1xf32>
    tpu.vector_store %arg7[%c1_55, %c0_56, %c0_57], %89 {strides = array<i32>} : memref<4x8x1xf32, #tpu.memory_space<vmem>>, vector<1x8x1xf32>,
    %c0_58 = arith.constant 0 : index
    %c64 = arith.constant 64 : index
    %90 = vector.load %arg3[%c0_58, %c64] : memref<8x128xf32, #tpu.memory_space<vmem>>, vector<8x32xf32>
    %cst_59 = arith.constant 0.176776692 : f32
    %91 = vector.broadcast %cst_59 : f32 to vector<8x32xf32>
    %92 = arith.mulf %90, %91 : vector<8x32xf32>
    %c0_60 = arith.constant 0 : index
    %c64_61 = arith.constant 64 : index
    %93 = vector.load %arg4[%c0_60, %c64_61] : memref<8x128xf32, #tpu.memory_space<vmem>>, vector<8x32xf32>
    %c0_62 = arith.constant 0 : index
    %c64_63 = arith.constant 64 : index
    %94 = vector.load %arg5[%c0_62, %c64_63] : memref<8x128xf32, #tpu.memory_space<vmem>>, vector<8x32xf32>
    %cst_64 = arith.constant dense<0.000000e+00> : vector<8x8xf32>
    %95 = tpu.matmul %92, %93, %cst_64 {dimension_numbers = #tpu.dot_dimension_numbers<[1], [1], [0], [0], [0, 0, 1, 0], [], []>} : vector<8x32xf32>, vector<8x32xf32>, vector<8x8xf32> -> vector<8x8xf32>
    %cst_65 = arith.constant 1.000000e-10 : f32
    %96 = vector.broadcast %cst_65 : f32 to vector<8x8xf32>
    %97 = arith.select %11, %96, %95 : vector<8x8xi1>, vector<8x8xf32>
    %c2 = arith.constant 2 : index
    %c0_66 = arith.constant 0 : index
    %c0_67 = arith.constant 0 : index
    %98 = vector.load %arg7[%c2, %c0_66, %c0_67] : memref<4x8x1xf32, #tpu.memory_space<vmem>>, vector<1x8x1xf32>
    %99 = vector.shape_cast %98 : vector<1x8x1xf32> to vector<8x1xf32>
    %cst_68 = arith.constant dense<0xFF800000> : vector<8xf32>
    %100 = vector.multi_reduction <maximumf>, %97, %cst_68 [1] : vector<8x8xf32> to vector<8xf32>
    %101 = vector.shape_cast %100 : vector<8xf32> to vector<8x1xf32>
    %102 = arith.maximumf %99, %101 : vector<8x1xf32>
    %103 = arith.subf %99, %102 : vector<8x1xf32>
    %104 = math.exp %103 : vector<8x1xf32>
    %105 = vector.broadcast %102 : vector<8x1xf32> to vector<8x8xf32>
    %106 = arith.subf %97, %105 : vector<8x8xf32>
    %107 = math.exp %106 : vector<8x8xf32>
    %c2_69 = arith.constant 2 : index
    %c0_70 = arith.constant 0 : index
    %c0_71 = arith.constant 0 : index
    %108 = vector.load %arg8[%c2_69, %c0_70, %c0_71] : memref<4x8x1xf32, #tpu.memory_space<vmem>>, vector<1x8x1xf32>
    %109 = vector.shape_cast %108 : vector<1x8x1xf32> to vector<8x1xf32>
    %110 = arith.mulf %104, %109 : vector<8x1xf32>
    %cst_72 = arith.constant dense<0.000000e+00> : vector<8xf32>
    %111 = vector.multi_reduction <add>, %107, %cst_72 [1] : vector<8x8xf32> to vector<8xf32>
    %112 = vector.shape_cast %111 : vector<8xf32> to vector<8x1xf32>
    %113 = arith.addf %110, %112 : vector<8x1xf32>
    %c2_73 = arith.constant 2 : index
    %c0_74 = arith.constant 0 : index
    %c0_75 = arith.constant 0 : index
    %114 = vector.load %arg8[%c2_73, %c0_74, %c0_75] : memref<4x8x1xf32, #tpu.memory_space<vmem>>, vector<1x8x1xf32>
    %115 = vector.shape_cast %114 : vector<1x8x1xf32> to vector<8x1xf32>
    %116 = vector.shape_cast %113 : vector<8x1xf32> to vector<1x8x1xf32>
    tpu.vector_store %arg8[%c2_73, %c0_74, %c0_75], %116 {strides = array<i32>} : memref<4x8x1xf32, #tpu.memory_space<vmem>>, vector<1x8x1xf32>,
    %cst_76 = arith.constant dense<0.000000e+00> : vector<8x32xf32>
    %117 = tpu.matmul %107, %94, %cst_76 {dimension_numbers = #tpu.dot_dimension_numbers<[1], [0], [0], [1], [0, 0, 1, 1], [], []>} : vector<8x8xf32>, vector<8x32xf32>, vector<8x32xf32> -> vector<8x32xf32>
    %c2_77 = arith.constant 2 : index
    %c0_78 = arith.constant 0 : index
    %c0_79 = arith.constant 0 : index
    %118 = vector.load %arg9[%c2_77, %c0_78, %c0_79] : memref<4x8x32xf32, #tpu.memory_space<vmem>>, vector<1x8x32xf32>
    %119 = vector.shape_cast %118 : vector<1x8x32xf32> to vector<8x32xf32>
    %120 = vector.broadcast %104 : vector<8x1xf32> to vector<8x32xf32>
    %121 = arith.mulf %120, %119 : vector<8x32xf32>
    %122 = arith.addf %121, %117 : vector<8x32xf32>
    %c2_80 = arith.constant 2 : index
    %c0_81 = arith.constant 0 : index
    %c0_82 = arith.constant 0 : index
    %123 = vector.load %arg9[%c2_80, %c0_81, %c0_82] : memref<4x8x32xf32, #tpu.memory_space<vmem>>, vector<1x8x32xf32>
    %124 = vector.shape_cast %123 : vector<1x8x32xf32> to vector<8x32xf32>
    %125 = vector.shape_cast %122 : vector<8x32xf32> to vector<1x8x32xf32>
    tpu.vector_store %arg9[%c2_80, %c0_81, %c0_82], %125 {strides = array<i32>} : memref<4x8x32xf32, #tpu.memory_space<vmem>>, vector<1x8x32xf32>,
    %c2_83 = arith.constant 2 : index
    %c0_84 = arith.constant 0 : index
    %c0_85 = arith.constant 0 : index
    %126 = vector.load %arg7[%c2_83, %c0_84, %c0_85] : memref<4x8x1xf32, #tpu.memory_space<vmem>>, vector<1x8x1xf32>
    %127 = vector.shape_cast %126 : vector<1x8x1xf32> to vector<8x1xf32>
    %128 = vector.shape_cast %102 : vector<8x1xf32> to vector<1x8x1xf32>
    tpu.vector_store %arg7[%c2_83, %c0_84, %c0_85], %128 {strides = array<i32>} : memref<4x8x1xf32, #tpu.memory_space<vmem>>, vector<1x8x1xf32>,
    %c0_86 = arith.constant 0 : index
    %c96 = arith.constant 96 : index
    %129 = vector.load %arg3[%c0_86, %c96] : memref<8x128xf32, #tpu.memory_space<vmem>>, vector<8x32xf32>
    %cst_87 = arith.constant 0.176776692 : f32
    %130 = vector.broadcast %cst_87 : f32 to vector<8x32xf32>
    %131 = arith.mulf %129, %130 : vector<8x32xf32>
    %c0_88 = arith.constant 0 : index
    %c96_89 = arith.constant 96 : index
    %132 = vector.load %arg4[%c0_88, %c96_89] : memref<8x128xf32, #tpu.memory_space<vmem>>, vector<8x32xf32>
    %c0_90 = arith.constant 0 : index
    %c96_91 = arith.constant 96 : index
    %133 = vector.load %arg5[%c0_90, %c96_91] : memref<8x128xf32, #tpu.memory_space<vmem>>, vector<8x32xf32>
    %cst_92 = arith.constant dense<0.000000e+00> : vector<8x8xf32>
    %134 = tpu.matmul %131, %132, %cst_92 {dimension_numbers = #tpu.dot_dimension_numbers<[1], [1], [0], [0], [0, 0, 1, 0], [], []>} : vector<8x32xf32>, vector<8x32xf32>, vector<8x8xf32> -> vector<8x8xf32>
    %cst_93 = arith.constant 1.000000e-10 : f32
    %135 = vector.broadcast %cst_93 : f32 to vector<8x8xf32>
    %136 = arith.select %11, %135, %134 : vector<8x8xi1>, vector<8x8xf32>
    %c3 = arith.constant 3 : index
    %c0_94 = arith.constant 0 : index
    %c0_95 = arith.constant 0 : index
    %137 = vector.load %arg7[%c3, %c0_94, %c0_95] : memref<4x8x1xf32, #tpu.memory_space<vmem>>, vector<1x8x1xf32>
    %138 = vector.shape_cast %137 : vector<1x8x1xf32> to vector<8x1xf32>
    %cst_96 = arith.constant dense<0xFF800000> : vector<8xf32>
    %139 = vector.multi_reduction <maximumf>, %136, %cst_96 [1] : vector<8x8xf32> to vector<8xf32>
    %140 = vector.shape_cast %139 : vector<8xf32> to vector<8x1xf32>
    %141 = arith.maximumf %138, %140 : vector<8x1xf32>
    %142 = arith.subf %138, %141 : vector<8x1xf32>
    %143 = math.exp %142 : vector<8x1xf32>
    %144 = vector.broadcast %141 : vector<8x1xf32> to vector<8x8xf32>
    %145 = arith.subf %136, %144 : vector<8x8xf32>
    %146 = math.exp %145 : vector<8x8xf32>
    %c3_97 = arith.constant 3 : index
    %c0_98 = arith.constant 0 : index
    %c0_99 = arith.constant 0 : index
    %147 = vector.load %arg8[%c3_97, %c0_98, %c0_99] : memref<4x8x1xf32, #tpu.memory_space<vmem>>, vector<1x8x1xf32>
    %148 = vector.shape_cast %147 : vector<1x8x1xf32> to vector<8x1xf32>
    %149 = arith.mulf %143, %148 : vector<8x1xf32>
    %cst_100 = arith.constant dense<0.000000e+00> : vector<8xf32>
    %150 = vector.multi_reduction <add>, %146, %cst_100 [1] : vector<8x8xf32> to vector<8xf32>
    %151 = vector.shape_cast %150 : vector<8xf32> to vector<8x1xf32>
    %152 = arith.addf %149, %151 : vector<8x1xf32>
    %c3_101 = arith.constant 3 : index
    %c0_102 = arith.constant 0 : index
    %c0_103 = arith.constant 0 : index
    %153 = vector.load %arg8[%c3_101, %c0_102, %c0_103] : memref<4x8x1xf32, #tpu.memory_space<vmem>>, vector<1x8x1xf32>
    %154 = vector.shape_cast %153 : vector<1x8x1xf32> to vector<8x1xf32>
    %155 = vector.shape_cast %152 : vector<8x1xf32> to vector<1x8x1xf32>
    tpu.vector_store %arg8[%c3_101, %c0_102, %c0_103], %155 {strides = array<i32>} : memref<4x8x1xf32, #tpu.memory_space<vmem>>, vector<1x8x1xf32>,
    %cst_104 = arith.constant dense<0.000000e+00> : vector<8x32xf32>
    %156 = tpu.matmul %146, %133, %cst_104 {dimension_numbers = #tpu.dot_dimension_numbers<[1], [0], [0], [1], [0, 0, 1, 1], [], []>} : vector<8x8xf32>, vector<8x32xf32>, vector<8x32xf32> -> vector<8x32xf32>
    %c3_105 = arith.constant 3 : index
    %c0_106 = arith.constant 0 : index
    %c0_107 = arith.constant 0 : index
    %157 = vector.load %arg9[%c3_105, %c0_106, %c0_107] : memref<4x8x32xf32, #tpu.memory_space<vmem>>, vector<1x8x32xf32>
    %158 = vector.shape_cast %157 : vector<1x8x32xf32> to vector<8x32xf32>
    %159 = vector.broadcast %143 : vector<8x1xf32> to vector<8x32xf32>
    %160 = arith.mulf %159, %158 : vector<8x32xf32>
    %161 = arith.addf %160, %156 : vector<8x32xf32>
    %c3_108 = arith.constant 3 : index
    %c0_109 = arith.constant 0 : index
    %c0_110 = arith.constant 0 : index
    %162 = vector.load %arg9[%c3_108, %c0_109, %c0_110] : memref<4x8x32xf32, #tpu.memory_space<vmem>>, vector<1x8x32xf32>
    %163 = vector.shape_cast %162 : vector<1x8x32xf32> to vector<8x32xf32>
    %164 = vector.shape_cast %161 : vector<8x32xf32> to vector<1x8x32xf32>
    tpu.vector_store %arg9[%c3_108, %c0_109, %c0_110], %164 {strides = array<i32>} : memref<4x8x32xf32, #tpu.memory_space<vmem>>, vector<1x8x32xf32>,
    %c3_111 = arith.constant 3 : index
    %c0_112 = arith.constant 0 : index
    %c0_113 = arith.constant 0 : index
    %165 = vector.load %arg7[%c3_111, %c0_112, %c0_113] : memref<4x8x1xf32, #tpu.memory_space<vmem>>, vector<1x8x1xf32>
    %166 = vector.shape_cast %165 : vector<1x8x1xf32> to vector<8x1xf32>
    %167 = vector.shape_cast %141 : vector<8x1xf32> to vector<1x8x1xf32>
    tpu.vector_store %arg7[%c3_111, %c0_112, %c0_113], %167 {strides = array<i32>} : memref<4x8x1xf32, #tpu.memory_space<vmem>>, vector<1x8x1xf32>,
    %c0_i32_114 = arith.constant 0 : i32
    %168 = arith.cmpi eq, %arg2, %c0_i32_114 : i32
    %169 = arith.extui %168 : i1 to i32
    %c0_i32_115 = arith.constant 0 : i32
    %170 = arith.cmpi ne, %169, %c0_i32_115 : i32
    scf.if %170 {
      %c0_116 = arith.constant 0 : index
      %c0_117 = arith.constant 0 : index
      %c0_118 = arith.constant 0 : index
      %171 = vector.load %arg9[%c0_116, %c0_117, %c0_118] : memref<4x8x32xf32, #tpu.memory_space<vmem>>, vector<1x8x32xf32>
      %172 = vector.shape_cast %171 : vector<1x8x32xf32> to vector<8x32xf32>
      %c0_119 = arith.constant 0 : index
      %c0_120 = arith.constant 0 : index
      %c0_121 = arith.constant 0 : index
      %173 = vector.load %arg8[%c0_119, %c0_120, %c0_121] : memref<4x8x1xf32, #tpu.memory_space<vmem>>, vector<1x8x1xf32>
      %174 = vector.shape_cast %173 : vector<1x8x1xf32> to vector<8x1xf32>
      %175 = vector.broadcast %174 : vector<8x1xf32> to vector<8x32xf32>
      %176 = arith.divf %172, %175 : vector<8x32xf32>
      %c0_122 = arith.constant 0 : index
      %c0_123 = arith.constant 0 : index
      %177 = vector.load %arg6[%c0_122, %c0_123] : memref<8x128xf32, #tpu.memory_space<vmem>>, vector<8x32xf32>
      tpu.vector_store %arg6[%c0_122, %c0_123], %176 {strides = array<i32>} : memref<8x128xf32, #tpu.memory_space<vmem>>, vector<8x32xf32>,
      %c1_124 = arith.constant 1 : index
      %c0_125 = arith.constant 0 : index
      %c0_126 = arith.constant 0 : index
      %178 = vector.load %arg9[%c1_124, %c0_125, %c0_126] : memref<4x8x32xf32, #tpu.memory_space<vmem>>, vector<1x8x32xf32>
      %179 = vector.shape_cast %178 : vector<1x8x32xf32> to vector<8x32xf32>
      %c1_127 = arith.constant 1 : index
      %c0_128 = arith.constant 0 : index
      %c0_129 = arith.constant 0 : index
      %180 = vector.load %arg8[%c1_127, %c0_128, %c0_129] : memref<4x8x1xf32, #tpu.memory_space<vmem>>, vector<1x8x1xf32>
      %181 = vector.shape_cast %180 : vector<1x8x1xf32> to vector<8x1xf32>
      %182 = vector.broadcast %181 : vector<8x1xf32> to vector<8x32xf32>
      %183 = arith.divf %179, %182 : vector<8x32xf32>
      %c0_130 = arith.constant 0 : index
      %c32_131 = arith.constant 32 : index
      %184 = vector.load %arg6[%c0_130, %c32_131] : memref<8x128xf32, #tpu.memory_space<vmem>>, vector<8x32xf32>
      tpu.vector_store %arg6[%c0_130, %c32_131], %183 {strides = array<i32>} : memref<8x128xf32, #tpu.memory_space<vmem>>, vector<8x32xf32>,
      %c2_132 = arith.constant 2 : index
      %c0_133 = arith.constant 0 : index
      %c0_134 = arith.constant 0 : index
      %185 = vector.load %arg9[%c2_132, %c0_133, %c0_134] : memref<4x8x32xf32, #tpu.memory_space<vmem>>, vector<1x8x32xf32>
      %186 = vector.shape_cast %185 : vector<1x8x32xf32> to vector<8x32xf32>
      %c2_135 = arith.constant 2 : index
      %c0_136 = arith.constant 0 : index
      %c0_137 = arith.constant 0 : index
      %187 = vector.load %arg8[%c2_135, %c0_136, %c0_137] : memref<4x8x1xf32, #tpu.memory_space<vmem>>, vector<1x8x1xf32>
      %188 = vector.shape_cast %187 : vector<1x8x1xf32> to vector<8x1xf32>
      %189 = vector.broadcast %188 : vector<8x1xf32> to vector<8x32xf32>
      %190 = arith.divf %186, %189 : vector<8x32xf32>
      %c0_138 = arith.constant 0 : index
      %c64_139 = arith.constant 64 : index
      %191 = vector.load %arg6[%c0_138, %c64_139] : memref<8x128xf32, #tpu.memory_space<vmem>>, vector<8x32xf32>
      tpu.vector_store %arg6[%c0_138, %c64_139], %190 {strides = array<i32>} : memref<8x128xf32, #tpu.memory_space<vmem>>, vector<8x32xf32>,
      %c3_140 = arith.constant 3 : index
      %c0_141 = arith.constant 0 : index
      %c0_142 = arith.constant 0 : index
      %192 = vector.load %arg9[%c3_140, %c0_141, %c0_142] : memref<4x8x32xf32, #tpu.memory_space<vmem>>, vector<1x8x32xf32>
      %193 = vector.shape_cast %192 : vector<1x8x32xf32> to vector<8x32xf32>
      %c3_143 = arith.constant 3 : index
      %c0_144 = arith.constant 0 : index
      %c0_145 = arith.constant 0 : index
      %194 = vector.load %arg8[%c3_143, %c0_144, %c0_145] : memref<4x8x1xf32, #tpu.memory_space<vmem>>, vector<1x8x1xf32>
      %195 = vector.shape_cast %194 : vector<1x8x1xf32> to vector<8x1xf32>
      %196 = vector.broadcast %195 : vector<8x1xf32> to vector<8x32xf32>
      %197 = arith.divf %193, %196 : vector<8x32xf32>
      %c0_146 = arith.constant 0 : index
      %c96_147 = arith.constant 96 : index
      %198 = vector.load %arg6[%c0_146, %c96_147] : memref<8x128xf32, #tpu.memory_space<vmem>>, vector<8x32xf32>
      tpu.vector_store %arg6[%c0_146, %c96_147], %197 {strides = array<i32>} : memref<8x128xf32, #tpu.memory_space<vmem>>, vector<8x32xf32>,
    } else {
    }
    return
  }
  func.func @transform_0(%arg0: i32, %arg1: i32, %arg2: i32) -> (i32, i32) {
    %c1_i32 = arith.constant 1 : i32
    %0 = arith.muli %arg0, %c1_i32 : i32
    %1 = arith.addi %0, %arg1 : i32
    %c0_i32 = arith.constant 0 : i32
    %c0_i32_0 = arith.constant 0 : i32
    return %1, %c0_i32 : i32, i32
  }
  func.func @transform_1(%arg0: i32, %arg1: i32, %arg2: i32) -> (i32, i32) {
    %c1_i32 = arith.constant 1 : i32
    %0 = arith.muli %arg0, %c1_i32 : i32
    %1 = arith.addi %0, %arg2 : i32
    %c1_i32_0 = arith.constant 1 : i32
    %c0_i32 = arith.constant 0 : i32
    return %1, %c1_i32_0 : i32, i32
  }
  func.func @transform_2(%arg0: i32, %arg1: i32, %arg2: i32) -> (i32, i32) {
    %c1_i32 = arith.constant 1 : i32
    %0 = arith.muli %arg0, %c1_i32 : i32
    %1 = arith.addi %0, %arg2 : i32
    %c2_i32 = arith.constant 2 : i32
    %c0_i32 = arith.constant 0 : i32
    return %1, %c2_i32 : i32, i32
  }
  func.func @transform_3(%arg0: i32, %arg1: i32, %arg2: i32) -> (i32, i32) {
    %c1_i32 = arith.constant 1 : i32
    %0 = arith.muli %arg0, %c1_i32 : i32
    %1 = arith.addi %0, %arg1 : i32
    %c0_i32 = arith.constant 0 : i32
    %c0_i32_0 = arith.constant 0 : i32
    return %1, %c0_i32 : i32, i32
  }
}

</mosaic_0001>

<bundles_post_ra>
// kernel: attention_forward.5
= control target key start
LH: loop header
LB: loop body
LE: loop exit
PB: predicated region body
PF: predicated region fallthrough
CT: control target
= control target key end

     0   :  { %s314_s0 = inlined_call_operand.vmem [shape: f32[16,128], index: 0, kind: input, shape index: {}]   ;;  %s315_s1 = inlined_call_operand.vmem [shape: f32[128,128], index: 1, kind: input, shape index: {}]   ;;  %s316_s2 = inlined_call_operand.vmem [shape: f32[1,128], index: 2, kind: input, shape index: {}]   ;;  %s317_s3 = inlined_call_operand.hbm [shape: f32[16,128], index: 3, kind: output, shape index: {}]  }
   0x1   :  { %v40_v0 = vld [vmem:[%s315_s1 + $0x78] sm:$0xff]  ;;  %v39_v1 = vld [vmem:[%s315_s1 + $0x70] sm:$0xff]  ;;  %v38_v2 = vld [vmem:[%s315_s1 + $0x68] sm:$0xff] }
   0x2   :  { %171 = vmatprep.subr.mxu0 %v40_v0  ;;  %v37_v3 = vld [vmem:[%s315_s1 + $0x60] sm:$0xff]  ;;  %v36_v5 = vld [vmem:[%s315_s1 + $0x58] sm:$0xff] }
   0x3   :  { %172 = vmatpush3.msra.mxu0 %v40_v0  ;;  %v23_v4 = vld [vmem:[%s314_s0] sm:$0xff] }
   0x4   :  { %173 = vmatprep.subr.mxu0 %v39_v1  ;;  %203 = vmatprep.mubr.f32.mxu0 %v23_v4 }
   0x5   :  { %174 = vmatpush3.msra.mxu0 %v39_v1 }
   0x6   :  { %175 = vmatprep.subr.mxu0 %v38_v2 }
   0x7   :  { %176 = vmatpush3.msra.mxu0 %v38_v2 }
   0x8   :  { %8 = vsyncpa [#allocation4], 0  ;;  %177 = vmatprep.subr.mxu0 %v37_v3  ;;  %v35_v6 = vld [vmem:[%s315_s1 + $0x50] sm:$0xff]  ;;  %v34_v7 = vld [vmem:[%s315_s1 + $0x48] sm:$0xff]  ;;  %s231_s23 = smov [#allocation3]  }
   0x9   :  { %178 = vmatpush3.msra.mxu0 %v37_v3  ;;  %v33_v8 = vld [vmem:[%s315_s1 + $0x40] sm:$0xff]  ;;  %v32_v9 = vld [vmem:[%s315_s1 + $0x38] sm:$0xff]  ;;  %v31_v10 = vld [vmem:[%s315_s1 + $0x30] sm:$0xff]  ;;  %s141_s24 = sshll.u32 %s231_s23, 4  ;;  %s142_s24 = int_to_ptr.vmem [resolvable:$true] %s141_s24 }
   0xa   :  { %179 = vmatprep.subr.mxu0 %v36_v5  ;;  %v30_v11 = vld [vmem:[%s315_s1 + $0x28] sm:$0xff]  ;;  %v29_v12 = vld [vmem:[%s315_s1 + $0x20] sm:$0xff]  ;;  %v28_v13 = vld [vmem:[%s315_s1 + $0x18] sm:$0xff]  ;;  %p214_p1 = scmp.lt.s32.totalorder %s142_s24, %s142_s24 }
   0xb   :  { %180 = vmatpush3.msra.mxu0 %v36_v5  ;;  %v27_v14 = vld [vmem:[%s315_s1 + $0x10] sm:$0xff]  ;;  %v26_v15 = vld [vmem:[%s315_s1 + $0x8] sm:$0xff]  ;;  %v25_v16 = vld [vmem:[%s315_s1] sm:$0xff]  ;;  %s209_s1 = scalar_lea.vmem %s142_s24, 256 }
   0xc   :  { %181 = vmatprep.subr.mxu0 %v35_v6  ;;  %v24_v17 = vld [vmem:[%s314_s0 + $0x8] sm:$0xff]  ;;  %v152_v18 = vld [vmem:[%s316_s2] ss:$0 sm:$0xff]  ;;  %p210_p0 = scmp.ne.s32.totalorder %s142_s24, %s209_s1  ;;  %p215_p2 = scmp.lt.s32.totalorder %s209_s1, %s209_s1 }
   0xd   :  { %182 = vmatpush3.msra.mxu0 %v35_v6 }
   0xe   :  { %183 = vmatprep.subr.mxu0 %v34_v7  ;;  %p216_p3 = por %p215_p2, %p214_p1 }
   0xf   :  { %184 = vmatpush3.msra.mxu0 %v34_v7 }
  0x10   :  { %185 = vmatprep.subr.mxu0 %v33_v8  ;;  %p217_p4 = pnand %p216_p3, %p210_p0 }
  0x11   :  { %186 = vmatpush3.msra.mxu0 %v33_v8 }
  0x12   :  { %187 = vmatprep.subr.mxu0 %v32_v9 }
  0x13   :  { %188 = vmatpush3.msra.mxu0 %v32_v9 }
  0x14   :  { %189 = vmatprep.subr.mxu0 %v31_v10 }
  0x15   :  { %190 = vmatpush3.msra.mxu0 %v31_v10 }
  0x16   :  { %191 = vmatprep.subr.mxu0 %v30_v11 }
  0x17   :  { %192 = vmatpush3.msra.mxu0 %v30_v11 }
  0x18   :  { %193 = vmatprep.subr.mxu0 %v29_v12 }
  0x19   :  { %194 = vmatpush3.msra.mxu0 %v29_v12 }
  0x1a   :  { %195 = vmatprep.subr.mxu0 %v28_v13 }
  0x1b   :  { %196 = vmatpush3.msra.mxu0 %v28_v13 }
  0x1c   :  { %197 = vmatprep.subr.mxu0 %v27_v14 }
  0x1d   :  { %198 = vmatpush3.msra.mxu0 %v27_v14 }
  0x1e   :  { %199 = vmatprep.subr.mxu0 %v26_v15 }
  0x1f   :  { %200 = vmatpush3.msra.mxu0 %v26_v15 }
  0x20   :  { %201 = vmatprep.subr.mxu0 %v25_v16 }
  0x21   :  { %202 = vmatpush3.msra.mxu0 %v25_v16 }
  0x22   :  { %204 = vmatmul.mubr.f32.vlgmr.msra.gmra.mxu0 %v24_v17 }
  0xe2   :  { %v205_v19 = vpop.f32.mrf.mxu0 }
  0xe3   :  { %v133_v20 = vadd.f32 %v205_v19, %v152_v18 }
  0xe4   :  { %v107_v21 = vpop.f32.mrf.mxu0 }
  0xe5   :  { %135 = vst [vmem:[#allocation3 + $0x8] sm:$0xff] %v133_v20  ;;  %v132_v22 = vadd.f32 %v152_v18, %v107_v21 }
  0xe7   :  { %134 = vst [vmem:[#allocation3] sm:$0xff] %v132_v22 }
  0xe8   :  { %220 = shalt.err (!%p217_p4)
}
  0xe9   :  { %s232_s0 = smov 128   ;;  %s233_s25 = smov 8  }
  0xea   :  { %147 = dma.vmem_to_hbm [thread:$0]  %s142_s24, 256, %s317_s3, [#allocation4], %s232_s0, %s232_s0, %s233_s25  }
  0xeb   :  { %229 = dma.done.wait [#allocation4], 256  }
  0xec   :  { %230 = vsyncadd [#allocation4], 4294967040 }
  0xed   :  { %151 = vsyncpa [#allocation4], 1 }

// kernel: attention_forward.3
= control target key start
LH: loop header
LB: loop body
LE: loop exit
PB: predicated region body
PF: predicated region fallthrough
CT: control target
= control target key end

     0   :  { %v340_v3 = vmov 0.0   ;;  %v255_v51 = vlaneseq  ;;  %s534_s1 = inlined_call_operand.vmem [shape: f32[128,384], index: 1, kind: input, shape index: {}]   ;;  %s535_s0 = inlined_call_operand.vmem [shape: f32[16,128], index: 0, kind: input, shape index: {}]   ;;  %s536_s2 = inlined_call_operand.vmem [shape: f32[1,384], index: 2, kind: input, shape index: {}]   ;;  %s537_s3 = inlined_call_operand.vmem [shape: f32[16,384], index: 3, kind: output, shape index: {}]  }
   0x1   :  { %v78_v0 = vld [vmem:[%s534_s1 + $0x170] sm:$0xff]  ;;  %v77_v1 = vld [vmem:[%s534_s1 + $0x168] sm:$0xff]  ;;  %v75_v2 = vld [vmem:[%s534_s1 + $0x158] sm:$0xff]  ;;  %144 = vmatprep.mubr.f32.mxu0 %v340_v3 }
   0x2   :  { %80 = vmatprep.subr.mxu0 %v78_v0  ;;  %v79_v4 = vld [vmem:[%s534_s1 + $0x178] sm:$0xff]  ;;  %v74_v5 = vld [vmem:[%s534_s1 + $0x150] sm:$0xff]  ;;  %v72_v6 = vld [vmem:[%s534_s1 + $0x140] sm:$0xff]  ;;  %v256_v52 = vshrl.u32 %v255_v51, 7 }
   0x3   :  { %81 = vmatpush1.msra.mxu0 %v77_v1  ;;  %304 = vmatprep.subr.mxu1 %v79_v4  ;;  %v76_v7 = vld [vmem:[%s534_s1 + $0x160] sm:$0xff]  ;;  %v71_v8 = vld [vmem:[%s534_s1 + $0x138] sm:$0xff]  ;;  %v73_v9 = vld [vmem:[%s534_s1 + $0x148] sm:$0xff] }
   0x4   :  { %82 = vmatprep.subr.mxu0 %v75_v2  ;;  %305 = vmatpush3.msra.mxu1 %v79_v4  ;;  %v69_v10 = vld [vmem:[%s534_s1 + $0x128] sm:$0xff]  ;;  %v68_v11 = vld [vmem:[%s534_s1 + $0x120] sm:$0xff]  ;;  %v70_v12 = vld [vmem:[%s534_s1 + $0x130] sm:$0xff]  ;;  %v257_v53 = vsub.s32 0, %v256_v52  ;;  %v261_v55 = vsub.s32 1, %v256_v52  ;;  %v265_v56 = vsub.s32 2, %v256_v52 }
   0x5   :  { %83 = vmatpush1.msra.mxu0 %v74_v5  ;;  %306 = vmatprep.subr.mxu1 %v76_v7  ;;  %v66_v13 = vld [vmem:[%s534_s1 + $0x110] sm:$0xff]  ;;  %v65_v14 = vld [vmem:[%s534_s1 + $0x108] sm:$0xff]  ;;  %v67_v15 = vld [vmem:[%s534_s1 + $0x118] sm:$0xff] }
   0x6   :  { %84 = vmatprep.subr.mxu0 %v72_v6  ;;  %307 = vmatpush3.msra.mxu1 %v76_v7  ;;  %v63_v16 = vld [vmem:[%s534_s1 + $0xf8] sm:$0xff]  ;;  %v62_v17 = vld [vmem:[%s534_s1 + $0xf0] sm:$0xff]  ;;  %v64_v18 = vld [vmem:[%s534_s1 + $0x100] sm:$0xff] }
   0x7   :  { %85 = vmatpush1.msra.mxu0 %v71_v8  ;;  %308 = vmatprep.subr.mxu1 %v73_v9  ;;  %v60_v19 = vld [vmem:[%s534_s1 + $0xe0] sm:$0xff]  ;;  %v59_v20 = vld [vmem:[%s534_s1 + $0xd8] sm:$0xff]  ;;  %v61_v21 = vld [vmem:[%s534_s1 + $0xe8] sm:$0xff] }
   0x8   :  { %86 = vmatprep.subr.mxu0 %v69_v10  ;;  %309 = vmatpush3.msra.mxu1 %v73_v9  ;;  %v57_v22 = vld [vmem:[%s534_s1 + $0xc8] sm:$0xff]  ;;  %v56_v23 = vld [vmem:[%s534_s1 + $0xc0] sm:$0xff]  ;;  %v58_v24 = vld [vmem:[%s534_s1 + $0xd0] sm:$0xff] }
   0x9   :  { %87 = vmatpush1.msra.mxu0 %v68_v11  ;;  %310 = vmatprep.subr.mxu1 %v70_v12  ;;  %v54_v25 = vld [vmem:[%s534_s1 + $0xb0] sm:$0xff]  ;;  %v53_v26 = vld [vmem:[%s534_s1 + $0xa8] sm:$0xff]  ;;  %v55_v27 = vld [vmem:[%s534_s1 + $0xb8] sm:$0xff] }
   0xa   :  { %88 = vmatprep.subr.mxu0 %v66_v13  ;;  %311 = vmatpush3.msra.mxu1 %v70_v12  ;;  %v51_v28 = vld [vmem:[%s534_s1 + $0x98] sm:$0xff]  ;;  %v50_v29 = vld [vmem:[%s534_s1 + $0x90] sm:$0xff]  ;;  %v52_v30 = vld [vmem:[%s534_s1 + $0xa0] sm:$0xff] }
   0xb   :  { %89 = vmatpush1.msra.mxu0 %v65_v14  ;;  %312 = vmatprep.subr.mxu1 %v67_v15  ;;  %v48_v31 = vld [vmem:[%s534_s1 + $0x80] sm:$0xff]  ;;  %v47_v32 = vld [vmem:[%s534_s1 + $0x78] sm:$0xff]  ;;  %v49_v33 = vld [vmem:[%s534_s1 + $0x88] sm:$0xff] }
   0xc   :  { %90 = vmatprep.subr.mxu0 %v63_v16  ;;  %313 = vmatpush3.msra.mxu1 %v67_v15  ;;  %v45_v34 = vld [vmem:[%s534_s1 + $0x68] sm:$0xff]  ;;  %v44_v35 = vld [vmem:[%s534_s1 + $0x60] sm:$0xff]  ;;  %v46_v36 = vld [vmem:[%s534_s1 + $0x70] sm:$0xff] }
   0xd   :  { %91 = vmatpush1.msra.mxu0 %v62_v17  ;;  %314 = vmatprep.subr.mxu1 %v64_v18  ;;  %v42_v37 = vld [vmem:[%s534_s1 + $0x50] sm:$0xff]  ;;  %v41_v38 = vld [vmem:[%s534_s1 + $0x48] sm:$0xff]  ;;  %v43_v39 = vld [vmem:[%s534_s1 + $0x58] sm:$0xff] }
   0xe   :  { %92 = vmatprep.subr.mxu0 %v60_v19  ;;  %315 = vmatpush3.msra.mxu1 %v64_v18  ;;  %v39_v40 = vld [vmem:[%s534_s1 + $0x38] sm:$0xff]  ;;  %v38_v41 = vld [vmem:[%s534_s1 + $0x30] sm:$0xff]  ;;  %v40_v42 = vld [vmem:[%s534_s1 + $0x40] sm:$0xff] }
   0xf   :  { %93 = vmatpush1.msra.mxu0 %v59_v20  ;;  %316 = vmatprep.subr.mxu1 %v61_v21  ;;  %v36_v43 = vld [vmem:[%s534_s1 + $0x20] sm:$0xff]  ;;  %v35_v44 = vld [vmem:[%s534_s1 + $0x18] sm:$0xff]  ;;  %v37_v45 = vld [vmem:[%s534_s1 + $0x28] sm:$0xff] }
  0x10   :  { %94 = vmatprep.subr.mxu0 %v57_v22  ;;  %317 = vmatpush3.msra.mxu1 %v61_v21  ;;  %v33_v46 = vld [vmem:[%s534_s1 + $0x8] sm:$0xff]  ;;  %v32_v47 = vld [vmem:[%s534_s1] sm:$0xff]  ;;  %v34_v48 = vld [vmem:[%s534_s1 + $0x10] sm:$0xff] }
  0x11   :  { %95 = vmatpush1.msra.mxu0 %v56_v23  ;;  %318 = vmatprep.subr.mxu1 %v58_v24  ;;  %v30_v49 = vld [vmem:[%s535_s0] sm:$0xff]  ;;  %v31_v50 = vld [vmem:[%s535_s0 + $0x8] sm:$0xff] }
  0x12   :  { %96 = vmatprep.subr.mxu0 %v54_v25  ;;  %319 = vmatpush3.msra.mxu1 %v58_v24  ;;  %v253_v54 = vld [vmem:[%s536_s2] sm:$0x7] }
  0x13   :  { %97 = vmatpush1.msra.mxu0 %v53_v26  ;;  %320 = vmatprep.subr.mxu1 %v55_v27  ;;  %v258_v57 = vrot.slane %v253_v54, %v257_v53  ;;  %v262_v58 = vrot.slane %v253_v54, %v261_v55  ;;  %v266_v59 = vrot.slane %v253_v54, %v265_v56 }
  0x14   :  { %98 = vmatprep.subr.mxu0 %v51_v28  ;;  %321 = vmatpush3.msra.mxu1 %v55_v27 }
  0x15   :  { %99 = vmatpush1.msra.mxu0 %v50_v29  ;;  %322 = vmatprep.subr.mxu1 %v52_v30 }
  0x16   :  { %100 = vmatprep.subr.mxu0 %v48_v31  ;;  %323 = vmatpush3.msra.mxu1 %v52_v30 }
  0x17   :  { %101 = vmatpush1.msra.mxu0 %v47_v32  ;;  %324 = vmatprep.subr.mxu1 %v49_v33 }
  0x18   :  { %102 = vmatprep.subr.mxu0 %v45_v34  ;;  %325 = vmatpush3.msra.mxu1 %v49_v33 }
  0x19   :  { %103 = vmatpush1.msra.mxu0 %v44_v35  ;;  %326 = vmatprep.subr.mxu1 %v46_v36 }
  0x1a   :  { %104 = vmatprep.subr.mxu0 %v42_v37  ;;  %327 = vmatpush3.msra.mxu1 %v46_v36 }
  0x1b   :  { %105 = vmatpush1.msra.mxu0 %v41_v38  ;;  %328 = vmatprep.subr.mxu1 %v43_v39 }
  0x1c   :  { %106 = vmatprep.subr.mxu0 %v39_v40  ;;  %329 = vmatpush3.msra.mxu1 %v43_v39 }
  0x1d   :  { %107 = vmatpush1.msra.mxu0 %v38_v41  ;;  %330 = vmatprep.subr.mxu1 %v40_v42 }
  0x1e   :  { %108 = vmatprep.subr.mxu0 %v36_v43  ;;  %331 = vmatpush3.msra.mxu1 %v40_v42 }
  0x1f   :  { %109 = vmatpush1.msra.mxu0 %v35_v44  ;;  %332 = vmatprep.subr.mxu1 %v37_v45 }
  0x20   :  { %110 = vmatprep.subr.mxu0 %v33_v46  ;;  %333 = vmatpush3.msra.mxu1 %v37_v45 }
  0x21   :  { %111 = vmatpush1.msra.mxu0 %v32_v47  ;;  %334 = vmatprep.subr.mxu1 %v34_v48 }
  0x22   :  { %145 = vmatmul.mubr.f32.vlgmr.msra.gmra.mxu0 %v30_v49  ;;  %335 = vmatpush3.msra.mxu1 %v34_v48 }
  0x23   :  { %336 = vmatprep.mubr.f32.mxu1 %v30_v49  ;;  %150 = vmatprep.mubr.f32.mxu0 %v340_v3 }
  0x24   :  { %337 = vmatmul.mubr.f32.vlgmr.msra.gmra.mxu1 %v31_v50 }
  0x26   :  { %151 = vmatmul.mubr.f32.gmra.mxu0 %v31_v50 }
  0xe2   :  { %v146_v60 = vpop.f32.mrf.mxu0 }
  0xe3   :  { %v270_v61 = vadd.f32 %v258_v57, %v146_v60 }
  0xe4   :  { %v148_v62 = vpop.f32.mrf.mxu0  ;;  %v338_v63 = vpop.f32.mrf.mxu1 }
  0xe5   :  { %276 = vst [vmem:[%s537_s3] sm:$0xff] %v270_v61  ;;  %v271_v0 = vadd.f32 %v262_v58, %v148_v62  ;;  %v275_v1 = vadd.f32 %v338_v63, %v266_v59 }
  0xe6   :  { %v152_v2 = vpop.f32.mrf.mxu0  ;;  %v223_v3 = vpop.f32.mrf.mxu1 }
  0xe7   :  { %277 = vst [vmem:[%s537_s3 + $0x8] sm:$0xff] %v271_v0  ;;  %281 = vst [vmem:[%s537_s3 + $0x28] sm:$0xff] %v275_v1  ;;  %v273_v4 = vadd.f32 %v258_v57, %v152_v2  ;;  %v272_v5 = vadd.f32 %v266_v59, %v223_v3 }
  0xe8   :  { %v154_v6 = vpop.f32.mrf.mxu0 }
  0xe9   :  { %279 = vst [vmem:[%s537_s3 + $0x18] sm:$0xff] %v273_v4  ;;  %278 = vst [vmem:[%s537_s3 + $0x10] sm:$0xff] %v272_v5  ;;  %v274_v7 = vadd.f32 %v262_v58, %v154_v6 }
  0xeb   :  { %280 = vst [vmem:[%s537_s3 + $0x20] sm:$0xff] %v274_v7 }

// kernel: attention_forward.4
= control target key start
LH: loop header
LB: loop body
LE: loop exit
PB: predicated region body
PF: predicated region fallthrough
CT: control target
= control target key end

     0   :  { %s1431_s12 = smov 0   ;;  %s1433_s13 = smov 0   ;;  %s1605_s0 = inlined_call_operand.vmem [shape: f32[16,384], index: 0, kind: input, shape index: {}, may-alias: {0,1,2}]   ;;  %s1606_s1 = inlined_call_operand.vmem [shape: f32[16,384], index: 1, kind: input, shape index: {}, may-alias: {0,1,2}]   ;;  %s1607_s2 = inlined_call_operand.vmem [shape: f32[16,384], index: 2, kind: input, shape index: {}, may-alias: {0,1,2}]   ;;  %s1608_s3 = inlined_call_operand.vmem [shape: f32[16,128], index: 3, kind: output, shape index: {}]  }
   0x1   :  { %s1435_s14 = smov 0  }
   0x2 LB: > { %s32_s15 = sadd.s32 1, %s1398_s13  ;;  %p1239_p0 = scmp.ge.s32.totalorder %s1402_s14, 1  ;;  %s1402_s14 = sphi %s1435_s14, %s13_s14   ;;  %s1398_s13 = sphi %s1433_s13, %s1610_s13   ;;  %s1394_s12 = sphi %s1431_s12, %s1609_s12  }
   0x3   : > { %p34_p1 = scmp.ge.s32.totalorder %s32_s15, 2  ;;  %p192_p2 = scmp.lt.s32.totalorder %s1402_s14, 3 }
   0x5   : > { %s1612_s15 = smov (%p34_p1, %s32_s15), 0  ;;  %p193_p3 = pnand %p1239_p0, %p192_p2 }
   0x6   : > { %p232_p4 = scmp.lt.s32.totalorder (!%p193_p3), %s1394_s12, 1  ;;  %s1408_s23 = smov (!%p193_p3), 96  }
   0x7   : > { %196 = sbr.rel (%p193_p3) target bundleno = 1391 (0x56f), region = 32  ;;  %s1409_s24 = smov (!%p193_p3), 64  }
   0x8   : > { %s1410_s25 = smov (!%p193_p3), 32  }
   0xc   : > { %vm273_vm0 = vcmask 261120   ;;  %v1404_v0 = vmov 0.0   ;;  %vm1405_vm1 = vmmov 0   ;;  %s1614_s12 = smov (!%p232_p4, %s1394_s12), 1  ;;  %vm264_vm2 = vcmask 7168  }
   0xd   : > { %1282 = vmatprep.subr.mxu0 %v1404_v0  ;;  %274 = vst.msk [vmem:[#allocation4] sm:$0xff] %vm273_vm0, %v1404_v0  ;;  %275 = vst.msk [vmem:[#allocation4 + $0x8] sm:$0xff] %vm273_vm0, %v1404_v0  ;;  %1284 = vmatprep.mubr.msk.f32.mxu0 %vm1405_vm1, %v1404_v0  ;;  %s1466_s16 = smul.u32 24, %s1614_s12  ;;  %v1406_v4 = vmov -inf   ;;  %v280_v5 = vlaneseq  ;;  %vm372_vm4 = vcmask 64512   ;;  %v1407_v12 = vmov 0  }
   0xe   : > { %276 = vst.msk [vmem:[#allocation4 + $0x10] sm:$0xff] %vm273_vm0, %v1404_v0  ;;  %277 = vst.msk [vmem:[#allocation4 + $0x18] sm:$0xff] %vm273_vm0, %v1404_v0  ;;  %1287 = vmatprep.subr.mxu1 %v1404_v0  ;;  %1289 = vmatprep.mubr.msk.f32.mxu1 %vm1405_vm1, %v1404_v0  ;;  %s1243_s29 = sshll.u32 %s1614_s12, 3  ;;  %vm1099_vm5 = vcmask 523520   ;;  %vm1114_vm6 = vcmask 785920   ;;  %vm1129_vm7 = vcmask 1048320  }
   0xf   : > { %s1179_s19 = scalar_lea.vmem %s1606_s1, %s1466_s16  ;;  %s236_s22 = scalar_lea.vmem %s1605_s0, %s1466_s16  ;;  %265 = vst.msk [vmem:[#allocation2] sm:$0xff] %vm264_vm2, %v1406_v4  ;;  %266 = vst.msk [vmem:[#allocation2 + $0x8] sm:$0xff] %vm264_vm2, %v1406_v4  ;;  %v1493_v6 = vshrl.u32 %v280_v5, 7  ;;  %v1495_v7 = vand.u32 127, %v280_v5  ;;  %1354 = vset.pattern.permute.xlu0 %v1407_v12  ;;  %1355 = vset.pattern.permute.xlu1 %v1407_v12 }
  0x10   : > { %v1244_v1 = vld [vmem:[%s1179_s19 + $0x8] sm:$0xff]  ;;  %v289_v2 = vld [vmem:[%s236_s22] sm:$0xff]  ;;  %267 = vst.msk [vmem:[#allocation2 + $0x10] sm:$0xff] %vm264_vm2, %v1406_v4  ;;  %268 = vst.msk [vmem:[#allocation2 + $0x18] sm:$0xff] %vm264_vm2, %v1406_v4  ;;  %s1183_s28 = scalar_lea.vmem %s1607_s2, %s1466_s16  ;;  %s258_s5 = scalar_lea.vmem %s1608_s3, %s1243_s29 }
  0x11   : > { %1283 = vmatpush3.xpose.msk.msra.mxu0 %vm273_vm0, %v1244_v1  ;;  %v290_v3 = vmul.f32 0.17677669, %v289_v2  ;;  %269 = vst.msk [vmem:[#allocation3] sm:$0xff] %vm264_vm2, %v1404_v0  ;;  %270 = vst.msk [vmem:[#allocation3 + $0x8] sm:$0xff] %vm264_vm2, %v1404_v0  ;;  %vm288_vm3 = vcmp.lt.s32.totalorder %v1493_v6, %v1495_v7  ;;  %487 = vrot.lane.b32.xlu1 %v1244_v1, %s1408_s23  ;;  %v1245_v17 = vld [vmem:[%s1183_s28 + $0x10] sm:$0xff] }
  0x12   : > { %1297 = vmatprep.subr.mxu0 %v1404_v0  ;;  %271 = vst.msk [vmem:[#allocation3 + $0x10] sm:$0xff] %vm264_vm2, %v1404_v0  ;;  %272 = vst.msk [vmem:[#allocation3 + $0x18] sm:$0xff] %vm264_vm2, %v1404_v0  ;;  %1288 = vmatpush3.msra.mxu1 %v1245_v17 }
  0x13   : > { %1292 = vmatprep.subr.mxu1 %v1404_v0 }
  0x14   : > { %1285 = vmatmul.mubr.msk.f32.vlgmr.msra.gmra.mxu0 %vm273_vm0, %v290_v3 }
  0x15   : > { %1299 = vmatprep.mubr.msk.f32.mxu0 %vm1405_vm1, %v1404_v0  ;;  %484 = vrot.lane.b32.xlu1 %v290_v3, %s1408_s23 }
  0x16   : > { %v1509_v13 = vld [vmem:[#allocation2] sm:$0xff]  ;;  %v565_v42 = vld [vmem:[#allocation2 + $0x8] sm:$0xff] }
  0x17   : > { %v763_v45 = vld [vmem:[#allocation2 + $0x10] sm:$0xff]  ;;  %v961_v49 = vld [vmem:[#allocation2 + $0x18] sm:$0xff] }
  0x19   : > { %685 = vrot.lane.b32.xlu1 %v1244_v1, %s1409_s24 }
  0x1d   : > { %682 = vrot.lane.b32.xlu1 %v290_v3, %s1409_s24 }
  0x21   : > { %883 = vrot.lane.b32.xlu1 %v1244_v1, %s1410_s25 }
  0x25   : > { %880 = vrot.lane.b32.xlu1 %v290_v3, %s1410_s25 }
  0x83   : > { %v488_v18 = vpop.permute.xlu1 %487 }
  0x87   : > { %v485_v22 = vpop.permute.xlu1 %484 }
  0x8b   : > { %v686_v23 = vpop.permute.xlu1 %685 }
  0x8f   : > { %v683_v24 = vpop.permute.xlu1 %682 }
  0x93   : > { %v884_v26 = vpop.permute.xlu1 %883 }
  0x97   : > { %v881_v27 = vpop.permute.xlu1 %880 }
  0xd4   : > { %v366_v8 = vpop.f32.mrf.mxu0 }
  0xd5   : > { %v370_v9 = vsel %vm288_vm3, 1e-10, %v366_v8 }
  0xd6   : > { %v1286_v10 = vpop.f32.mrf.mxu0  ;;  %v373_v11 = vsel %vm372_vm4, %v370_v9, -inf }
  0xd7   : > { %374 = vmax.xlane.f32.xlu0 %v373_v11 }
 0x160   : > { %v375_v14 = vpop.xlane.xlu0 %374 }
 0x161   : > { %v1512_v15 = vmax.f32 %v1509_v13, %v375_v14 }
 0x163   : > { %v377_v16 = vsub.f32 %v1509_v13, %v1512_v15  ;;  %478 = vst.msk [vmem:[#allocation2] sm:$0xff] %vm264_vm2, %v1512_v15  ;;  %382 = vperm.xlu0 %1354, %v1512_v15  }
 0x165   : > { %v378_v12 = vmul.f32 1.442695, %v377_v16 }
 0x1de   : > { %v383_v19 = vpop.permute.xlu0 %382 }
 0x1df   : > { %v385_v20 = vsub.f32 %v370_v9, %v383_v19 }
 0x1e1   : > { %v386_v21 = vmul.f32 1.442695, %v385_v20  ;;  %v582_v20 = vld [vmem:[#allocation3 + $0x8] sm:$0xff] }
 0x1e3   : > { %1356 = vpow2.f32 %v386_v21 }
 0x1f0   : > { %v1524_v25 = vpop.eup %1356 }
 0x1f1   : > { %1290 = vmatmul.mubr.msk.f32.vlgmr.msra.gmra.mxu1 %vm372_vm4, %v1524_v25  ;;  %v390_v8 = vsel %vm372_vm4, %v1524_v25, 0.0 }
 0x1f2   : > { %1293 = vmatpush3.xpose.msk.msra.mxu1 %vm273_vm0, %v488_v18  ;;  %1294 = vmatprep.mubr.msk.f32.mxu1 %vm1405_vm1, %v1404_v0 }
 0x1f3   : > { %1302 = vmatprep.subr.mxu1 %v1404_v0 }
 0x1f5   : > { %1295 = vmatmul.mubr.msk.f32.vlgmr.msra.gmra.mxu1 %vm273_vm0, %v485_v22 }
 0x1f6   : > { %1303 = vmatpush3.xpose.msk.msra.mxu1 %vm273_vm0, %v686_v23  ;;  %1304 = vmatprep.mubr.msk.f32.mxu1 %vm1405_vm1, %v1404_v0  ;;  %v780_v23 = vld [vmem:[#allocation3 + $0x10] sm:$0xff] }
 0x1f7   : > { %1312 = vmatprep.subr.mxu1 %v1404_v0 }
 0x1f9   : > { %1305 = vmatmul.mubr.msk.f32.vlgmr.msra.gmra.mxu1 %vm273_vm0, %v683_v24  ;;  %v388_v24 = vld [vmem:[#allocation3] sm:$0xff] }
 0x1fa   : > { %1313 = vmatpush3.xpose.msk.msra.mxu1 %vm273_vm0, %v884_v26  ;;  %1314 = vmatprep.mubr.msk.f32.mxu1 %vm1405_vm1, %v1404_v0 }
 0x1fd   : > { %1315 = vmatmul.mubr.msk.f32.vlgmr.msra.gmra.mxu1 %vm273_vm0, %v881_v27  ;;  %v978_v27 = vld [vmem:[#allocation3 + $0x18] sm:$0xff] }
 0x2b1   : > { %v1542_v28 = vpop.f32.mrf.mxu1 }
 0x2b3   : > { %v1291_v29 = vpop.f32.mrf.mxu1 }
 0x2b5   : > { %v559_v30 = vpop.f32.mrf.mxu1 }
 0x2b6   : > { %v563_v31 = vsel %vm288_vm3, 1e-10, %v559_v30 }
 0x2b7   : > { %v1296_v32 = vpop.f32.mrf.mxu1  ;;  %v566_v33 = vsel %vm372_vm4, %v563_v31, -inf }
 0x2b8   : > { %567 = vmax.xlane.f32.xlu1 %v566_v33 }
 0x2b9   : > { %v757_v34 = vpop.f32.mrf.mxu1 }
 0x2ba   : > { %v761_v35 = vsel %vm288_vm3, 1e-10, %v757_v34 }
 0x2bb   : > { %v1306_v36 = vpop.f32.mrf.mxu1  ;;  %v764_v37 = vsel %vm372_vm4, %v761_v35, -inf }
 0x2bc   : > { %765 = vmax.xlane.f32.xlu0 %v764_v37  ;;  %v469_v37 = vld [vmem:[#allocation4] sm:$0xff] }
 0x2bd   : > { %v955_v38 = vpop.f32.mrf.mxu1 }
 0x2be   : > { %v959_v39 = vsel %vm288_vm3, 1e-10, %v955_v38 }
 0x2bf   : > { %v1316_v40 = vpop.f32.mrf.mxu1  ;;  %v962_v41 = vsel %vm372_vm4, %v959_v39, -inf }
 0x2c0   : > { %963 = vmax.xlane.f32.xlu1 %v962_v41 }
 0x341   : > { %v568_v43 = vpop.xlane.xlu1 %567 }
 0x342   : > { %v569_v44 = vmax.f32 %v565_v42, %v568_v43  ;;  %v667_v43 = vld [vmem:[#allocation4 + $0x8] sm:$0xff] }
 0x344   : > { %v570_v46 = vsub.f32 %v565_v42, %v569_v44  ;;  %676 = vst.msk [vmem:[#allocation2 + $0x8] sm:$0xff] %vm264_vm2, %v569_v44  ;;  %575 = vperm.xlu1 %1355, %v569_v44  }
 0x345   : > { %v766_v47 = vpop.xlane.xlu0 %765 }
 0x346   : > { %v767_v48 = vmax.f32 %v763_v45, %v766_v47  ;;  %v571_v6 = vmul.f32 1.442695, %v570_v46 }
 0x348   : > { %v768_v50 = vsub.f32 %v763_v45, %v767_v48  ;;  %874 = vst.msk [vmem:[#allocation2 + $0x10] sm:$0xff] %vm264_vm2, %v767_v48  ;;  %773 = vperm.xlu0 %1354, %v767_v48   ;;  %v865_v45 = vld [vmem:[#allocation4 + $0x10] sm:$0xff] }
 0x349   : > { %v964_v51 = vpop.xlane.xlu1 %963 }
 0x34a   : > { %v965_v52 = vmax.f32 %v961_v49, %v964_v51  ;;  %v769_v10 = vmul.f32 1.442695, %v768_v50  ;;  %v1063_v51 = vld [vmem:[#allocation4 + $0x18] sm:$0xff] }
 0x34c   : > { %v966_v53 = vsub.f32 %v961_v49, %v965_v52  ;;  %1072 = vst.msk [vmem:[#allocation2 + $0x18] sm:$0xff] %vm264_vm2, %v965_v52  ;;  %971 = vperm.xlu1 %1355, %v965_v52  }
 0x34e   : > { %v967_v14 = vmul.f32 1.442695, %v966_v53 }
 0x350   : > { %590 = vrot.lane.b32.xlu1 %v1245_v17, %s1408_s23 }
 0x354   : > { %788 = vrot.lane.b32.xlu1 %v1245_v17, %s1409_s24 }
 0x358   : > { %986 = vrot.lane.b32.xlu1 %v1245_v17, %s1410_s25 }
 0x3bf   : > { %v576_v54 = vpop.permute.xlu1 %575 }
 0x3c0   : > { %v578_v55 = vsub.f32 %v563_v31, %v576_v54 }
 0x3c2   : > { %v579_v56 = vmul.f32 1.442695, %v578_v55 }
 0x3c3   : > { %v774_v57 = vpop.permute.xlu0 %773 }
 0x3c4   : > { %1358 = vpow2.f32 %v579_v56  ;;  %v776_v58 = vsub.f32 %v761_v35, %v774_v57 }
 0x3c6   : > { %v777_v59 = vmul.f32 1.442695, %v776_v58 }
 0x3c7   : > { %v972_v60 = vpop.permute.xlu1 %971 }
 0x3c8   : > { %1360 = vpow2.f32 %v777_v59  ;;  %v974_v61 = vsub.f32 %v959_v39, %v972_v60 }
 0x3ca   : > { %v975_v62 = vmul.f32 1.442695, %v974_v61 }
 0x3cb   : > { %v591_v63 = vpop.permute.xlu1 %590 }
 0x3cc   : > { %1362 = vpow2.f32 %v975_v62  ;;  %1298 = vmatpush3.msra.mxu0 %v591_v63 }
 0x3cd   : > { %1307 = vmatprep.subr.mxu0 %v1404_v0  ;;  %1364 = vpow2.f32 %v571_v6 }
 0x3ce   : > { %1366 = vpow2.f32 %v769_v10 }
 0x3cf   : > { %v789_v1 = vpop.permute.xlu1 %788  ;;  %1368 = vpow2.f32 %v378_v12 }
 0x3d0   : > { %1370 = vpow2.f32 %v967_v14 }
 0x3d1   : > { %v1359_v2 = vpop.eup %1358 }
 0x3d2   : > { %1300 = vmatmul.mubr.msk.f32.vlgmr.msra.gmra.mxu0 %vm372_vm4, %v1359_v2  ;;  %v584_v3 = vsel %vm372_vm4, %v1359_v2, 0.0 }
 0x3d3   : > { %585 = vadd.xlane.f32.xlu1 %v584_v3  ;;  %1308 = vmatpush3.msra.mxu0 %v789_v1  ;;  %v987_v5 = vpop.permute.xlu1 %986 }
 0x3d4   : > { %1309 = vmatprep.mubr.msk.f32.mxu0 %vm1405_vm1, %v1404_v0  ;;  %1317 = vmatprep.subr.mxu0 %v1404_v0 }
 0x3d5   : > { %v1361_v4 = vpop.eup %1360 }
 0x3d6   : > { %1310 = vmatmul.mubr.msk.f32.vlgmr.msra.gmra.mxu0 %vm372_vm4, %v1361_v4  ;;  %v782_v7 = vsel %vm372_vm4, %v1361_v4, 0.0 }
 0x3d7   : > { %783 = vadd.xlane.f32.xlu0 %v782_v7  ;;  %391 = vadd.xlane.f32.xlu1 %v390_v8 }
 0x3d8   : > { %1318 = vmatpush3.msra.mxu0 %v987_v5  ;;  %1319 = vmatprep.mubr.msk.f32.mxu0 %vm1405_vm1, %v1404_v0 }
 0x3d9   : > { %v1363_v9 = vpop.eup %1362 }
 0x3da   : > { %1320 = vmatmul.mubr.msk.f32.vlgmr.msra.gmra.mxu0 %vm372_vm4, %v1363_v9  ;;  %v980_v11 = vsel %vm372_vm4, %v1363_v9, 0.0  ;;  %v1365_v17 = vpop.eup %1364 }
 0x3db   : > { %981 = vadd.xlane.f32.xlu0 %v980_v11  ;;  %v1367_v18 = vpop.eup %1366  ;;  %v583_v21 = vmul.f32 %v1365_v17, %v582_v20 }
 0x3dc   : > { %v1369_v0 = vpop.eup %1368  ;;  %v781_v13 = vmul.f32 %v1367_v18, %v780_v23 }
 0x3dd   : > { %v1371_v19 = vpop.eup %1370  ;;  %v389_v15 = vmul.f32 %v1369_v0, %v388_v24 }
 0x3de   : > { %v979_v31 = vmul.f32 %v1371_v19, %v978_v27 }
 0x3e8   : > { %670 = vperm.xlu1 %1355, %v1365_v17  }
 0x3ec   : > { %868 = vperm.xlu1 %1355, %v1367_v18  }
 0x3f1   : > { %472 = vperm.xlu0 %1354, %v1369_v0  }
 0x3f5   : > { %1066 = vperm.xlu0 %1354, %v1371_v19  }
 0x45c   : > { %v586_v22 = vpop.xlane.xlu1 %585 }
 0x45d   : > { %v587_v25 = vadd.f32 %v586_v22, %v583_v21 }
 0x45f   : > { %588 = vst.msk [vmem:[#allocation3 + $0x8] sm:$0xff] %vm264_vm2, %v587_v25 }
 0x460   : > { %v784_v16 = vpop.xlane.xlu0 %783  ;;  %v392_v26 = vpop.xlane.xlu1 %391 }
 0x461   : > { %v785_v29 = vadd.f32 %v784_v16, %v781_v13  ;;  %v393_v30 = vadd.f32 %v392_v26, %v389_v15 }
 0x463   : > { %786 = vst.msk [vmem:[#allocation3 + $0x10] sm:$0xff] %vm264_vm2, %v785_v29  ;;  %395 = vst.msk [vmem:[#allocation3] sm:$0xff] %vm264_vm2, %v393_v30 }
 0x464   : > { %v982_v32 = vpop.xlane.xlu0 %981  ;;  %v671_v42 = vpop.permute.xlu1 %670 }
 0x465   : > { %v983_v33 = vadd.f32 %v982_v32, %v979_v31  ;;  %v673_v44 = vmul.f32 %v671_v42, %v667_v43 }
 0x466   : > { %v1087_v34 = vld [vmem:[#allocation3 + $0x8] sm:$0xff] }
 0x467   : > { %984 = vst.msk [vmem:[#allocation3 + $0x18] sm:$0xff] %vm264_vm2, %v983_v33  ;;  %1090 = vperm.xlu0 %1354, %v1087_v34  }
 0x468   : > { %v869_v46 = vpop.permute.xlu1 %868 }
 0x469   : > { %v871_v50 = vmul.f32 %v869_v46, %v865_v45 }
 0x46a   : > { %v1102_v35 = vld [vmem:[#allocation3 + $0x10] sm:$0xff]  ;;  %v1077_v36 = vld [vmem:[#allocation3] sm:$0xff] }
 0x46b   : > { %1105 = vperm.xlu0 %1354, %v1102_v35   ;;  %1080 = vperm.xlu1 %1355, %v1077_v36  }
 0x46c   : > { %v473_v38 = vpop.permute.xlu0 %472 }
 0x46d   : > { %v475_v39 = vmul.f32 %v473_v38, %v469_v37 }
 0x46e   : > { %v1117_v40 = vld [vmem:[#allocation3 + $0x18] sm:$0xff] }
 0x46f   : > { %v476_v41 = vadd.f32 %v475_v39, %v1542_v28  ;;  %1120 = vperm.xlu0 %1354, %v1117_v40  }
 0x470   : > { %v1067_v52 = vpop.permute.xlu0 %1066 }
 0x471   : > { %477 = vst.msk [vmem:[#allocation4] sm:$0xff] %vm273_vm0, %v476_v41  ;;  %v1069_v28 = vmul.f32 %v1067_v52, %v1063_v51 }
 0x478   : > { %v1076_v7 = vld [vmem:[#allocation4] sm:$0xff] }
 0x492   : > { %v662_v47 = vpop.f32.mrf.mxu0 }
 0x493   : > { %v674_v48 = vadd.f32 %v673_v44, %v662_v47 }
 0x494   : > { %v1301_v49 = vpop.f32.mrf.mxu0 }
 0x495   : > { %675 = vst.msk [vmem:[#allocation4 + $0x8] sm:$0xff] %vm273_vm0, %v674_v48 }
 0x496   : > { %v860_v53 = vpop.f32.mrf.mxu0 }
 0x497   : > { %v872_v54 = vadd.f32 %v871_v50, %v860_v53 }
 0x498   : > { %v1311_v55 = vpop.f32.mrf.mxu0 }
 0x499   : > { %873 = vst.msk [vmem:[#allocation4 + $0x10] sm:$0xff] %vm273_vm0, %v872_v54 }
 0x49a   : > { %v1058_v56 = vpop.f32.mrf.mxu0 }
 0x49b   : > { %v1070_v57 = vadd.f32 %v1069_v28, %v1058_v56 }
 0x49c   : > { %v1321_v58 = vpop.f32.mrf.mxu0  ;;  %v1086_v1 = vld [vmem:[#allocation4 + $0x8] sm:$0xff] }
 0x49d   : > { %1071 = vst.msk [vmem:[#allocation4 + $0x18] sm:$0xff] %vm273_vm0, %v1070_v57 }
 0x4a0   : > { %v1101_v4 = vld [vmem:[#allocation4 + $0x10] sm:$0xff] }
 0x4a4   : > { %v1116_v10 = vld [vmem:[#allocation4 + $0x18] sm:$0xff] }
 0x4e2   : > { %v1091_v59 = vpop.permute.xlu0 %1090 }
 0x4e3   : > { %1372 = vrcp.f32 %v1091_v59 }
 0x4e6   : > { %v1106_v60 = vpop.permute.xlu0 %1105  ;;  %v1081_v61 = vpop.permute.xlu1 %1080 }
 0x4e7   : > { %1374 = vrcp.f32 %v1106_v60 }
 0x4e8   : > { %1376 = vrcp.f32 %v1081_v61 }
 0x4ea   : > { %v1121_v62 = vpop.permute.xlu0 %1120 }
 0x4eb   : > { %1378 = vrcp.f32 %v1121_v62 }
 0x4f0   : > { %v1373_v63 = vpop.eup %1372 }
 0x4f1   : > { %v1094_v2 = vmul.f32 %v1373_v63, %v1086_v1 }
 0x4f3   : > { %1096 = vrot.lane.b32.xlu1 %v1094_v2, %s1410_s25 }
 0x4f4   : > { %v1375_v3 = vpop.eup %1374 }
 0x4f5   : > { %v1377_v5 = vpop.eup %1376  ;;  %v1109_v6 = vmul.f32 %v1375_v3, %v1101_v4 }
 0x4f6   : > { %v1084_v8 = vmul.f32 %v1377_v5, %v1076_v7 }
 0x4f7   : > { %1111 = vrot.lane.b32.xlu1 %v1109_v6, %s1409_s24 }
 0x4f8   : > { %v1379_v9 = vpop.eup %1378  ;;  %1085 = vst.msk [vmem:[%s258_s5] sm:$0xff] %vm273_vm0, %v1084_v8 }
 0x4f9   : > { %v1124_v11 = vmul.f32 %v1379_v9, %v1116_v10 }
 0x4fb   : > { %1126 = vrot.lane.b32.xlu1 %v1124_v11, %s1408_s23 }
 0x565   : > { %v1097_v12 = vpop.permute.xlu1 %1096 }
 0x566   : > { %1100 = vst.msk [vmem:[%s258_s5] sm:$0xff] %vm1099_vm5, %v1097_v12 }
 0x569   : > { %v1112_v14 = vpop.permute.xlu1 %1111 }
 0x56a   : > { %1115 = vst.msk [vmem:[%s258_s5] sm:$0xff] %vm1114_vm6, %v1112_v14 }
 0x56d   : > { %v1127_v17 = vpop.permute.xlu1 %1126 }
 0x56e   : > { %1130 = vst.msk [vmem:[%s258_s5] sm:$0xff] %vm1129_vm7, %v1127_v17 }
 0x56f PF: > { %s13_s14 = sadd.s32 1, %s1402_s14   ;;  %s1609_s12 = smov %s1398_s13 }
 0x570   : > { %p10_p5 = scmp.ge.s32.totalorder %s13_s14, 4   ;;  %s1610_s13 = smov %s1612_s15 }
 0x572   :  { %12 = sbr.rel (!%p10_p5) target bundleno = 2 (0x2), region = 85 }

</bundles_post_ra>
